<compile_context>
chip_gen: v5e
topology: v5e:2x2
jax: 0.10.0
libtpu: 0.0.40
codegen_flags: <defaults>
</compile_context>

<pallas_src>
import functools

import jax
import jax.numpy as jnp
import numpy as np
from jax.experimental import pallas as pl
from jax.experimental.pallas import tpu as pltpu

KSIZE = 4
EPS = 1e-5
LEAKY_SLOPE = 0.2

# (Cin, Cout) per block, as in the PyTorch module.
SPECS = [(1, 16), (16, 32), (32, 32), (32, 64), (64, 64), (64, 128),
         (128, 128), (128, 256), (256, 256), (256, 512), (512, 512)]


def _round_up(v, m):
    return (v + m - 1) // m * m


def _pick_cout_tile(cout):
    """>=2 'parallel' grid blocks per call (v7x has 2 TCs), multiple of 8, <=128."""
    cand = min(128, max(8, cout // 2))
    if cout % cand == 0 and cand % 8 == 0:
        return cand
    return cout


# ------------------------- fused per-block kernel --------------------------- #

def _conv_block_kernel(x_ref, w_ref, b_ref, g_ref, bt_ref, a_ref, m_ref, o_ref,
                       *, offs, pp, inv_count, use_bn, eps):
    """conv(4x4, VALID) + bias + (Leaky/P)ReLU [+ batch-stat BatchNorm].

    x_ref : (Cin_pad, L)      bf16  activation slab, columns = (n, i, j) flat
    w_ref : (16, tc, Cin_pad) bf16  conv taps (t = kh*4+kw, cout, cin)
    b_ref/g_ref/bt_ref : (tc, 1) f32  bias / BN gamma / BN beta
    a_ref : (1,) f32 in SMEM        activation negative slope (0.2 or PReLU a)
    m_ref : (1, pp) f32             1.0 on valid (i<Ho, j<Wo) columns, else 0.0
    o_ref : (tc, pp) f32            output block (doubles as the f32 accumulator)
    """
    # 16 shifted-window matmuls accumulate straight into the f32 output block.
    o_ref[...] = jnp.dot(w_ref[0], x_ref[:, offs[0]:offs[0] + pp],
                         preferred_element_type=jnp.float32)
    for t in range(1, len(offs)):
        o_ref[...] += jnp.dot(w_ref[t], x_ref[:, offs[t]:offs[t] + pp],
                              preferred_element_type=jnp.float32)

    z = o_ref[...] + b_ref[...]
    alpha = a_ref[0]
    act = jnp.maximum(z, 0.0) + alpha * jnp.minimum(z, 0.0)
    mask = m_ref[...]
    if use_bn:
        # Training-mode BatchNorm2d: per-channel batch stats over the valid
        # (N, Ho, Wo) positions == masked reduction along the lane axis.
        mean = jnp.sum(act * mask, axis=1, keepdims=True) * inv_count
        cen = (act - mean) * mask
        var = jnp.sum(cen * cen, axis=1, keepdims=True) * inv_count
        act = cen * jax.lax.rsqrt(var + eps) * g_ref[...] + bt_ref[...]
    else:
        act = act * mask
    o_ref[...] = act.astype(o_ref.dtype)


def conv_block(x_cnhw, w_taps, bias, gamma, beta, alpha, *, use_bn):
    """x_cnhw: (Cin, N, H, W) -> (Cout, N, H-3, W-3) float32."""
    cin, n, h, w = x_cnhw.shape
    n_taps, cout, cin_pad = w_taps.shape
    ho, wo = h - KSIZE + 1, w - KSIZE + 1
    p = n * h * w
    ppr = _round_up(p, 128)                        # lane-dense output width
    tail = _round_up(KSIZE * w + KSIZE, 128)       # room for the max tap offset
    xlen = ppr + tail

    xf = x_cnhw.reshape(cin, p).astype(jnp.bfloat16)
    xf = jnp.pad(xf, ((0, cin_pad - cin), (0, xlen - p)))

    # Static valid-output-column mask (a constant under jit).
    mnp = np.zeros((n, h, w), np.float32)
    mnp[:, :ho, :wo] = 1.0
    mask = jnp.asarray(np.pad(mnp.reshape(1, p), ((0, 0), (0, ppr - p))))

    offs = tuple(kh * w + kw for kh in range(KSIZE) for kw in range(KSIZE))
    tc = _pick_cout_tile(cout)

    kernel = functools.partial(
        _conv_block_kernel, offs=offs, pp=ppr,
        inv_count=1.0 / float(n * ho * wo), use_bn=use_bn, eps=EPS)

    out = pl.pallas_call(
        kernel,
        out_shape=jax.ShapeDtypeStruct((cout, ppr), jnp.float32),
        grid_spec=pltpu.PrefetchScalarGridSpec(
            num_scalar_prefetch=0,
            grid=(cout // tc,),
            in_specs=[
                pl.BlockSpec((cin_pad, xlen), lambda c: (0, 0)),
                pl.BlockSpec((n_taps, tc, cin_pad), lambda c: (0, c, 0)),
                pl.BlockSpec((tc, 1), lambda c: (c, 0)),
                pl.BlockSpec((tc, 1), lambda c: (c, 0)),
                pl.BlockSpec((tc, 1), lambda c: (c, 0)),
                pl.BlockSpec(memory_space=pltpu.MemorySpace.SMEM),
                pl.BlockSpec((1, ppr), lambda c: (0, 0)),
            ],
            out_specs=pl.BlockSpec((tc, ppr), lambda c: (c, 0)),
        ),
        compiler_params=pltpu.CompilerParams(
            dimension_semantics=("parallel",),
            vmem_limit_bytes=32 * 1024 * 1024,
        ),
    )(xf, w_taps, bias, gamma, beta, alpha, mask)

    return out[:, :p].reshape(cout, n, h, w)[:, :, :ho, :wo]


# ------------------------------ parameters ---------------------------------- #

def init_params(key):
    blocks = []
    for idx, (cin, cout) in enumerate(SPECS):
        key, kw, kb = jax.random.split(key, 3)
        s = 1.0 / float(cin * KSIZE * KSIZE) ** 0.5
        blocks.append({
            "w": jax.random.uniform(kw, (cout, cin, KSIZE, KSIZE), jnp.float32, -s, s),
            "b": jax.random.uniform(kb, (cout,), jnp.float32, -s, s),
            "gamma": jnp.ones((cout,), jnp.float32),   # BatchNorm weight
            "beta": jnp.zeros((cout,), jnp.float32),   # BatchNorm bias
            # LeakyReLU(0.2) for blocks 1..10, PReLU (init 0.25) for block 11.
            "alpha": jnp.full((1,), 0.25 if idx == len(SPECS) - 1 else LEAKY_SLOPE,
                              jnp.float32),
        })
    return blocks


def prepare_params(params):
    """One-time weight repack: (Cout,Cin,4,4) f32 -> (16,Cout,Cin_pad) bf16 taps."""
    prep = []
    for blk in params:
        cout, cin, kh, kw = blk["w"].shape
        cin_pad = _round_up(cin, 8)
        w_taps = jnp.transpose(blk["w"], (2, 3, 0, 1)).reshape(kh * kw, cout, cin)
        if cin_pad != cin:
            w_taps = jnp.pad(w_taps, ((0, 0), (0, 0), (0, cin_pad - cin)))
        prep.append({
            "w": w_taps.astype(jnp.bfloat16),
            "b": blk["b"].reshape(cout, 1),
            "gamma": blk["gamma"].reshape(cout, 1),
            "beta": blk["beta"].reshape(cout, 1),
            "alpha": blk["alpha"],
        })
    return prep


# -------------------------------- forward ----------------------------------- #

def forward(x, prep):
    """x: (N, 1, H, W) -> (N, numel(x)/N + sum_i numel(out_i)/N), as in D.forward."""
    n = x.shape[0]
    feats = [x.reshape(n, -1)]
    cur = jnp.transpose(x, (1, 0, 2, 3))          # (Cin, N, H, W)
    for i, blk in enumerate(prep):
        use_bn = i < len(prep) - 1                # block 11: PReLU, no BatchNorm
        cur = conv_block(cur, blk["w"], blk["b"], blk["gamma"], blk["beta"],
                         blk["alpha"], use_bn=use_bn)
        feats.append(jnp.transpose(cur, (1, 0, 2, 3)).reshape(n, -1))
    return jnp.concatenate(feats, axis=1)


# ----------------------------- XLA reference -------------------------------- #

def _ref_block(x, w, b, gamma, beta, alpha, use_bn):
    y = jax.lax.conv_general_dilated(
        x, w, (1, 1), "VALID", dimension_numbers=("NCHW", "OIHW", "NCHW"))
    y = y + b.reshape(1, -1, 1, 1)
    y = jnp.where(y >= 0, y, alpha * y)
    if use_bn:
        mean = jnp.mean(y, axis=(0, 2, 3), keepdims=True)
        var = jnp.mean((y - mean) ** 2, axis=(0, 2, 3), keepdims=True)
        y = (y - mean) * jax.lax.rsqrt(var + EPS) * gamma.reshape(1, -1, 1, 1) \
            + beta.reshape(1, -1, 1, 1)
    return y


# ---------------------------------- main ------------------------------------ #

if __name__ == "__main__":
    key = jax.random.PRNGKey(0)
    pkey, xkey, tkey = jax.random.split(key, 3)

    # --- sanity-check one fused block against the XLA reference (bf16 tol) ---
    k1, k2, k3, k4, k5 = jax.random.split(tkey, 5)
    tx = jax.random.normal(k1, (2, 16, 10, 10), jnp.float32)
    tw = 0.1 * jax.random.normal(k2, (32, 16, KSIZE, KSIZE), jnp.float32)
    tb = 0.1 * jax.random.normal(k3, (32,), jnp.float32)
    tg = 1.0 + 0.1 * jax.random.normal(k4, (32,), jnp.float32)
    tbe = 0.1 * jax.random.normal(k5, (32,), jnp.float32)
    w_taps = jnp.transpose(tw, (2, 3, 0, 1)).reshape(16, 32, 16).astype(jnp.bfloat16)
    for slope, bn in ((LEAKY_SLOPE, True), (0.25, False)):
        y_pal = conv_block(jnp.transpose(tx, (1, 0, 2, 3)), w_taps,
                           tb.reshape(-1, 1), tg.reshape(-1, 1), tbe.reshape(-1, 1),
                           jnp.full((1,), slope, jnp.float32), use_bn=bn)
        y_pal = jnp.transpose(y_pal, (1, 0, 2, 3))
        y_ref = _ref_block(tx, tw, tb, tg, tbe, slope, bn)
        assert jnp.allclose(y_pal, y_ref, atol=5e-2, rtol=5e-2), \
            float(jnp.max(jnp.abs(y_pal - y_ref)))

    # --- full D forward (minimal spatial size for 11 valid 4x4 convs is 34) ---
    params = init_params(pkey)
    prep = prepare_params(params)          # static weight repack, outside jit
    x = jax.random.normal(xkey, (2, 1, 34, 34), jnp.float32)

    out = jax.block_until_ready(jax.jit(forward)(x, prep))

    expected = 1 * 34 * 34
    h = 34
    for _, cout in SPECS:
        h -= KSIZE - 1
        expected += cout * h * h
    assert out.shape == (2, expected), out.shape
    assert bool(jnp.all(jnp.isfinite(out)))
    print("KERNEL_OK")
</pallas_src>

<mosaic_0001>
module attributes {stable_mosaic.version = 11 : i64} {
  func.func @_conv_block_kernel(%arg0: i32, %arg1: memref<16x384xbf16, #tpu.memory_space<vmem>>, %arg2: memref<16x16x16xbf16, #tpu.memory_space<vmem>>, %arg3: memref<16x1xf32, #tpu.memory_space<vmem>>, %arg4: memref<16x1xf32, #tpu.memory_space<vmem>>, %arg5: memref<16x1xf32, #tpu.memory_space<vmem>>, %arg6: memref<1xf32, #tpu.memory_space<smem>>, %arg7: memref<1x256xf32, #tpu.memory_space<vmem>>, %arg8: memref<16x256xf32, #tpu.memory_space<vmem>>) attributes {dimension_semantics = [#tpu.dimension_semantics<parallel>], iteration_bounds = array<i64: 2>, scalar_prefetch = 0 : i64, scratch_operands = 0 : i64, tpu.core_type = #tpu.core_type<tc>, window_params = [{pipeline_mode = #tpu.pipeline_mode<synchronous>, transform_indices = @transform_0, window_bounds = array<i64: 16, 384>}, {transform_indices = @transform_1, window_bounds = array<i64: 16, 16, 16>}, {transform_indices = @transform_2, window_bounds = array<i64: 16, 1>}, {transform_indices = @transform_3, window_bounds = array<i64: 16, 1>}, {transform_indices = @transform_4, window_bounds = array<i64: 16, 1>}, {transform_indices = @transform_5, window_bounds = array<i64: 1>}, {pipeline_mode = #tpu.pipeline_mode<synchronous>, transform_indices = @transform_6, window_bounds = array<i64: 1, 256>}, {transform_indices = @transform_7, window_bounds = array<i64: 16, 256>}]} {
    %c0 = arith.constant 0 : index
    %c0_0 = arith.constant 0 : index
    %c0_1 = arith.constant 0 : index
    %0 = vector.load %arg2[%c0, %c0_0, %c0_1] : memref<16x16x16xbf16, #tpu.memory_space<vmem>>, vector<1x16x16xbf16>
    %1 = vector.shape_cast %0 : vector<1x16x16xbf16> to vector<16x16xbf16>
    %c0_2 = arith.constant 0 : index
    %c0_3 = arith.constant 0 : index
    %2 = vector.load %arg1[%c0_2, %c0_3] : memref<16x384xbf16, #tpu.memory_space<vmem>>, vector<16x256xbf16>
    %cst = arith.constant dense<0.000000e+00> : vector<16x256xf32>
    %3 = tpu.matmul %1, %2, %cst {dimension_numbers = #tpu.dot_dimension_numbers<[1], [0], [0], [1], [0, 0, 1, 1], [], []>} : vector<16x16xbf16>, vector<16x256xbf16>, vector<16x256xf32> -> vector<16x256xf32>
    %c0_4 = arith.constant 0 : index
    %c0_5 = arith.constant 0 : index
    %4 = vector.load %arg8[%c0_4, %c0_5] : memref<16x256xf32, #tpu.memory_space<vmem>>, vector<16x256xf32>
    tpu.vector_store %arg8[%c0_4, %c0_5], %3 {strides = array<i32>} : memref<16x256xf32, #tpu.memory_space<vmem>>, vector<16x256xf32>,
    %c0_6 = arith.constant 0 : index
    %c0_7 = arith.constant 0 : index
    %5 = vector.load %arg8[%c0_6, %c0_7] : memref<16x256xf32, #tpu.memory_space<vmem>>, vector<16x256xf32>
    %c1 = arith.constant 1 : index
    %c0_8 = arith.constant 0 : index
    %c0_9 = arith.constant 0 : index
    %6 = vector.load %arg2[%c1, %c0_8, %c0_9] : memref<16x16x16xbf16, #tpu.memory_space<vmem>>, vector<1x16x16xbf16>
    %7 = vector.shape_cast %6 : vector<1x16x16xbf16> to vector<16x16xbf16>
    %c0_10 = arith.constant 0 : index
    %c1_11 = arith.constant 1 : index
    %8 = vector.load %arg1[%c0_10, %c1_11] : memref<16x384xbf16, #tpu.memory_space<vmem>>, vector<16x256xbf16>
    %cst_12 = arith.constant dense<0.000000e+00> : vector<16x256xf32>
    %9 = tpu.matmul %7, %8, %cst_12 {dimension_numbers = #tpu.dot_dimension_numbers<[1], [0], [0], [1], [0, 0, 1, 1], [], []>} : vector<16x16xbf16>, vector<16x256xbf16>, vector<16x256xf32> -> vector<16x256xf32>
    %10 = arith.addf %5, %9 : vector<16x256xf32>
    %c0_13 = arith.constant 0 : index
    %c0_14 = arith.constant 0 : index
    %11 = vector.load %arg8[%c0_13, %c0_14] : memref<16x256xf32, #tpu.memory_space<vmem>>, vector<16x256xf32>
    tpu.vector_store %arg8[%c0_13, %c0_14], %10 {strides = array<i32>} : memref<16x256xf32, #tpu.memory_space<vmem>>, vector<16x256xf32>,
    %c0_15 = arith.constant 0 : index
    %c0_16 = arith.constant 0 : index
    %12 = vector.load %arg8[%c0_15, %c0_16] : memref<16x256xf32, #tpu.memory_space<vmem>>, vector<16x256xf32>
    %c2 = arith.constant 2 : index
    %c0_17 = arith.constant 0 : index
    %c0_18 = arith.constant 0 : index
    %13 = vector.load %arg2[%c2, %c0_17, %c0_18] : memref<16x16x16xbf16, #tpu.memory_space<vmem>>, vector<1x16x16xbf16>
    %14 = vector.shape_cast %13 : vector<1x16x16xbf16> to vector<16x16xbf16>
    %c0_19 = arith.constant 0 : index
    %c2_20 = arith.constant 2 : index
    %15 = vector.load %arg1[%c0_19, %c2_20] : memref<16x384xbf16, #tpu.memory_space<vmem>>, vector<16x256xbf16>
    %cst_21 = arith.constant dense<0.000000e+00> : vector<16x256xf32>
    %16 = tpu.matmul %14, %15, %cst_21 {dimension_numbers = #tpu.dot_dimension_numbers<[1], [0], [0], [1], [0, 0, 1, 1], [], []>} : vector<16x16xbf16>, vector<16x256xbf16>, vector<16x256xf32> -> vector<16x256xf32>
    %17 = arith.addf %12, %16 : vector<16x256xf32>
    %c0_22 = arith.constant 0 : index
    %c0_23 = arith.constant 0 : index
    %18 = vector.load %arg8[%c0_22, %c0_23] : memref<16x256xf32, #tpu.memory_space<vmem>>, vector<16x256xf32>
    tpu.vector_store %arg8[%c0_22, %c0_23], %17 {strides = array<i32>} : memref<16x256xf32, #tpu.memory_space<vmem>>, vector<16x256xf32>,
    %c0_24 = arith.constant 0 : index
    %c0_25 = arith.constant 0 : index
    %19 = vector.load %arg8[%c0_24, %c0_25] : memref<16x256xf32, #tpu.memory_space<vmem>>, vector<16x256xf32>
    %c3 = arith.constant 3 : index
    %c0_26 = arith.constant 0 : index
    %c0_27 = arith.constant 0 : index
    %20 = vector.load %arg2[%c3, %c0_26, %c0_27] : memref<16x16x16xbf16, #tpu.memory_space<vmem>>, vector<1x16x16xbf16>
    %21 = vector.shape_cast %20 : vector<1x16x16xbf16> to vector<16x16xbf16>
    %c0_28 = arith.constant 0 : index
    %c3_29 = arith.constant 3 : index
    %22 = vector.load %arg1[%c0_28, %c3_29] : memref<16x384xbf16, #tpu.memory_space<vmem>>, vector<16x256xbf16>
    %cst_30 = arith.constant dense<0.000000e+00> : vector<16x256xf32>
    %23 = tpu.matmul %21, %22, %cst_30 {dimension_numbers = #tpu.dot_dimension_numbers<[1], [0], [0], [1], [0, 0, 1, 1], [], []>} : vector<16x16xbf16>, vector<16x256xbf16>, vector<16x256xf32> -> vector<16x256xf32>
    %24 = arith.addf %19, %23 : vector<16x256xf32>
    %c0_31 = arith.constant 0 : index
    %c0_32 = arith.constant 0 : index
    %25 = vector.load %arg8[%c0_31, %c0_32] : memref<16x256xf32, #tpu.memory_space<vmem>>, vector<16x256xf32>
    tpu.vector_store %arg8[%c0_31, %c0_32], %24 {strides = array<i32>} : memref<16x256xf32, #tpu.memory_space<vmem>>, vector<16x256xf32>,
    %c0_33 = arith.constant 0 : index
    %c0_34 = arith.constant 0 : index
    %26 = vector.load %arg8[%c0_33, %c0_34] : memref<16x256xf32, #tpu.memory_space<vmem>>, vector<16x256xf32>
    %c4 = arith.constant 4 : index
    %c0_35 = arith.constant 0 : index
    %c0_36 = arith.constant 0 : index
    %27 = vector.load %arg2[%c4, %c0_35, %c0_36] : memref<16x16x16xbf16, #tpu.memory_space<vmem>>, vector<1x16x16xbf16>
    %28 = vector.shape_cast %27 : vector<1x16x16xbf16> to vector<16x16xbf16>
    %c0_37 = arith.constant 0 : index
    %c10 = arith.constant 10 : index
    %29 = vector.load %arg1[%c0_37, %c10] : memref<16x384xbf16, #tpu.memory_space<vmem>>, vector<16x256xbf16>
    %cst_38 = arith.constant dense<0.000000e+00> : vector<16x256xf32>
    %30 = tpu.matmul %28, %29, %cst_38 {dimension_numbers = #tpu.dot_dimension_numbers<[1], [0], [0], [1], [0, 0, 1, 1], [], []>} : vector<16x16xbf16>, vector<16x256xbf16>, vector<16x256xf32> -> vector<16x256xf32>
    %31 = arith.addf %26, %30 : vector<16x256xf32>
    %c0_39 = arith.constant 0 : index
    %c0_40 = arith.constant 0 : index
    %32 = vector.load %arg8[%c0_39, %c0_40] : memref<16x256xf32, #tpu.memory_space<vmem>>, vector<16x256xf32>
    tpu.vector_store %arg8[%c0_39, %c0_40], %31 {strides = array<i32>} : memref<16x256xf32, #tpu.memory_space<vmem>>, vector<16x256xf32>,
    %c0_41 = arith.constant 0 : index
    %c0_42 = arith.constant 0 : index
    %33 = vector.load %arg8[%c0_41, %c0_42] : memref<16x256xf32, #tpu.memory_space<vmem>>, vector<16x256xf32>
    %c5 = arith.constant 5 : index
    %c0_43 = arith.constant 0 : index
    %c0_44 = arith.constant 0 : index
    %34 = vector.load %arg2[%c5, %c0_43, %c0_44] : memref<16x16x16xbf16, #tpu.memory_space<vmem>>, vector<1x16x16xbf16>
    %35 = vector.shape_cast %34 : vector<1x16x16xbf16> to vector<16x16xbf16>
    %c0_45 = arith.constant 0 : index
    %c11 = arith.constant 11 : index
    %36 = vector.load %arg1[%c0_45, %c11] : memref<16x384xbf16, #tpu.memory_space<vmem>>, vector<16x256xbf16>
    %cst_46 = arith.constant dense<0.000000e+00> : vector<16x256xf32>
    %37 = tpu.matmul %35, %36, %cst_46 {dimension_numbers = #tpu.dot_dimension_numbers<[1], [0], [0], [1], [0, 0, 1, 1], [], []>} : vector<16x16xbf16>, vector<16x256xbf16>, vector<16x256xf32> -> vector<16x256xf32>
    %38 = arith.addf %33, %37 : vector<16x256xf32>
    %c0_47 = arith.constant 0 : index
    %c0_48 = arith.constant 0 : index
    %39 = vector.load %arg8[%c0_47, %c0_48] : memref<16x256xf32, #tpu.memory_space<vmem>>, vector<16x256xf32>
    tpu.vector_store %arg8[%c0_47, %c0_48], %38 {strides = array<i32>} : memref<16x256xf32, #tpu.memory_space<vmem>>, vector<16x256xf32>,
    %c0_49 = arith.constant 0 : index
    %c0_50 = arith.constant 0 : index
    %40 = vector.load %arg8[%c0_49, %c0_50] : memref<16x256xf32, #tpu.memory_space<vmem>>, vector<16x256xf32>
    %c6 = arith.constant 6 : index
    %c0_51 = arith.constant 0 : index
    %c0_52 = arith.constant 0 : index
    %41 = vector.load %arg2[%c6, %c0_51, %c0_52] : memref<16x16x16xbf16, #tpu.memory_space<vmem>>, vector<1x16x16xbf16>
    %42 = vector.shape_cast %41 : vector<1x16x16xbf16> to vector<16x16xbf16>
    %c0_53 = arith.constant 0 : index
    %c12 = arith.constant 12 : index
    %43 = vector.load %arg1[%c0_53, %c12] : memref<16x384xbf16, #tpu.memory_space<vmem>>, vector<16x256xbf16>
    %cst_54 = arith.constant dense<0.000000e+00> : vector<16x256xf32>
    %44 = tpu.matmul %42, %43, %cst_54 {dimension_numbers = #tpu.dot_dimension_numbers<[1], [0], [0], [1], [0, 0, 1, 1], [], []>} : vector<16x16xbf16>, vector<16x256xbf16>, vector<16x256xf32> -> vector<16x256xf32>
    %45 = arith.addf %40, %44 : vector<16x256xf32>
    %c0_55 = arith.constant 0 : index
    %c0_56 = arith.constant 0 : index
    %46 = vector.load %arg8[%c0_55, %c0_56] : memref<16x256xf32, #tpu.memory_space<vmem>>, vector<16x256xf32>
    tpu.vector_store %arg8[%c0_55, %c0_56], %45 {strides = array<i32>} : memref<16x256xf32, #tpu.memory_space<vmem>>, vector<16x256xf32>,
    %c0_57 = arith.constant 0 : index
    %c0_58 = arith.constant 0 : index
    %47 = vector.load %arg8[%c0_57, %c0_58] : memref<16x256xf32, #tpu.memory_space<vmem>>, vector<16x256xf32>
    %c7 = arith.constant 7 : index
    %c0_59 = arith.constant 0 : index
    %c0_60 = arith.constant 0 : index
    %48 = vector.load %arg2[%c7, %c0_59, %c0_60] : memref<16x16x16xbf16, #tpu.memory_space<vmem>>, vector<1x16x16xbf16>
    %49 = vector.shape_cast %48 : vector<1x16x16xbf16> to vector<16x16xbf16>
    %c0_61 = arith.constant 0 : index
    %c13 = arith.constant 13 : index
    %50 = vector.load %arg1[%c0_61, %c13] : memref<16x384xbf16, #tpu.memory_space<vmem>>, vector<16x256xbf16>
    %cst_62 = arith.constant dense<0.000000e+00> : vector<16x256xf32>
    %51 = tpu.matmul %49, %50, %cst_62 {dimension_numbers = #tpu.dot_dimension_numbers<[1], [0], [0], [1], [0, 0, 1, 1], [], []>} : vector<16x16xbf16>, vector<16x256xbf16>, vector<16x256xf32> -> vector<16x256xf32>
    %52 = arith.addf %47, %51 : vector<16x256xf32>
    %c0_63 = arith.constant 0 : index
    %c0_64 = arith.constant 0 : index
    %53 = vector.load %arg8[%c0_63, %c0_64] : memref<16x256xf32, #tpu.memory_space<vmem>>, vector<16x256xf32>
    tpu.vector_store %arg8[%c0_63, %c0_64], %52 {strides = array<i32>} : memref<16x256xf32, #tpu.memory_space<vmem>>, vector<16x256xf32>,
    %c0_65 = arith.constant 0 : index
    %c0_66 = arith.constant 0 : index
    %54 = vector.load %arg8[%c0_65, %c0_66] : memref<16x256xf32, #tpu.memory_space<vmem>>, vector<16x256xf32>
    %c8 = arith.constant 8 : index
    %c0_67 = arith.constant 0 : index
    %c0_68 = arith.constant 0 : index
    %55 = vector.load %arg2[%c8, %c0_67, %c0_68] : memref<16x16x16xbf16, #tpu.memory_space<vmem>>, vector<1x16x16xbf16>
    %56 = vector.shape_cast %55 : vector<1x16x16xbf16> to vector<16x16xbf16>
    %c0_69 = arith.constant 0 : index
    %c20 = arith.constant 20 : index
    %57 = vector.load %arg1[%c0_69, %c20] : memref<16x384xbf16, #tpu.memory_space<vmem>>, vector<16x256xbf16>
    %cst_70 = arith.constant dense<0.000000e+00> : vector<16x256xf32>
    %58 = tpu.matmul %56, %57, %cst_70 {dimension_numbers = #tpu.dot_dimension_numbers<[1], [0], [0], [1], [0, 0, 1, 1], [], []>} : vector<16x16xbf16>, vector<16x256xbf16>, vector<16x256xf32> -> vector<16x256xf32>
    %59 = arith.addf %54, %58 : vector<16x256xf32>
    %c0_71 = arith.constant 0 : index
    %c0_72 = arith.constant 0 : index
    %60 = vector.load %arg8[%c0_71, %c0_72] : memref<16x256xf32, #tpu.memory_space<vmem>>, vector<16x256xf32>
    tpu.vector_store %arg8[%c0_71, %c0_72], %59 {strides = array<i32>} : memref<16x256xf32, #tpu.memory_space<vmem>>, vector<16x256xf32>,
    %c0_73 = arith.constant 0 : index
    %c0_74 = arith.constant 0 : index
    %61 = vector.load %arg8[%c0_73, %c0_74] : memref<16x256xf32, #tpu.memory_space<vmem>>, vector<16x256xf32>
    %c9 = arith.constant 9 : index
    %c0_75 = arith.constant 0 : index
    %c0_76 = arith.constant 0 : index
    %62 = vector.load %arg2[%c9, %c0_75, %c0_76] : memref<16x16x16xbf16, #tpu.memory_space<vmem>>, vector<1x16x16xbf16>
    %63 = vector.shape_cast %62 : vector<1x16x16xbf16> to vector<16x16xbf16>
    %c0_77 = arith.constant 0 : index
    %c21 = arith.constant 21 : index
    %64 = vector.load %arg1[%c0_77, %c21] : memref<16x384xbf16, #tpu.memory_space<vmem>>, vector<16x256xbf16>
    %cst_78 = arith.constant dense<0.000000e+00> : vector<16x256xf32>
    %65 = tpu.matmul %63, %64, %cst_78 {dimension_numbers = #tpu.dot_dimension_numbers<[1], [0], [0], [1], [0, 0, 1, 1], [], []>} : vector<16x16xbf16>, vector<16x256xbf16>, vector<16x256xf32> -> vector<16x256xf32>
    %66 = arith.addf %61, %65 : vector<16x256xf32>
    %c0_79 = arith.constant 0 : index
    %c0_80 = arith.constant 0 : index
    %67 = vector.load %arg8[%c0_79, %c0_80] : memref<16x256xf32, #tpu.memory_space<vmem>>, vector<16x256xf32>
    tpu.vector_store %arg8[%c0_79, %c0_80], %66 {strides = array<i32>} : memref<16x256xf32, #tpu.memory_space<vmem>>, vector<16x256xf32>,
    %c0_81 = arith.constant 0 : index
    %c0_82 = arith.constant 0 : index
    %68 = vector.load %arg8[%c0_81, %c0_82] : memref<16x256xf32, #tpu.memory_space<vmem>>, vector<16x256xf32>
    %c10_83 = arith.constant 10 : index
    %c0_84 = arith.constant 0 : index
    %c0_85 = arith.constant 0 : index
    %69 = vector.load %arg2[%c10_83, %c0_84, %c0_85] : memref<16x16x16xbf16, #tpu.memory_space<vmem>>, vector<1x16x16xbf16>
    %70 = vector.shape_cast %69 : vector<1x16x16xbf16> to vector<16x16xbf16>
    %c0_86 = arith.constant 0 : index
    %c22 = arith.constant 22 : index
    %71 = vector.load %arg1[%c0_86, %c22] : memref<16x384xbf16, #tpu.memory_space<vmem>>, vector<16x256xbf16>
    %cst_87 = arith.constant dense<0.000000e+00> : vector<16x256xf32>
    %72 = tpu.matmul %70, %71, %cst_87 {dimension_numbers = #tpu.dot_dimension_numbers<[1], [0], [0], [1], [0, 0, 1, 1], [], []>} : vector<16x16xbf16>, vector<16x256xbf16>, vector<16x256xf32> -> vector<16x256xf32>
    %73 = arith.addf %68, %72 : vector<16x256xf32>
    %c0_88 = arith.constant 0 : index
    %c0_89 = arith.constant 0 : index
    %74 = vector.load %arg8[%c0_88, %c0_89] : memref<16x256xf32, #tpu.memory_space<vmem>>, vector<16x256xf32>
    tpu.vector_store %arg8[%c0_88, %c0_89], %73 {strides = array<i32>} : memref<16x256xf32, #tpu.memory_space<vmem>>, vector<16x256xf32>,
    %c0_90 = arith.constant 0 : index
    %c0_91 = arith.constant 0 : index
    %75 = vector.load %arg8[%c0_90, %c0_91] : memref<16x256xf32, #tpu.memory_space<vmem>>, vector<16x256xf32>
    %c11_92 = arith.constant 11 : index
    %c0_93 = arith.constant 0 : index
    %c0_94 = arith.constant 0 : index
    %76 = vector.load %arg2[%c11_92, %c0_93, %c0_94] : memref<16x16x16xbf16, #tpu.memory_space<vmem>>, vector<1x16x16xbf16>
    %77 = vector.shape_cast %76 : vector<1x16x16xbf16> to vector<16x16xbf16>
    %c0_95 = arith.constant 0 : index
    %c23 = arith.constant 23 : index
    %78 = vector.load %arg1[%c0_95, %c23] : memref<16x384xbf16, #tpu.memory_space<vmem>>, vector<16x256xbf16>
    %cst_96 = arith.constant dense<0.000000e+00> : vector<16x256xf32>
    %79 = tpu.matmul %77, %78, %cst_96 {dimension_numbers = #tpu.dot_dimension_numbers<[1], [0], [0], [1], [0, 0, 1, 1], [], []>} : vector<16x16xbf16>, vector<16x256xbf16>, vector<16x256xf32> -> vector<16x256xf32>
    %80 = arith.addf %75, %79 : vector<16x256xf32>
    %c0_97 = arith.constant 0 : index
    %c0_98 = arith.constant 0 : index
    %81 = vector.load %arg8[%c0_97, %c0_98] : memref<16x256xf32, #tpu.memory_space<vmem>>, vector<16x256xf32>
    tpu.vector_store %arg8[%c0_97, %c0_98], %80 {strides = array<i32>} : memref<16x256xf32, #tpu.memory_space<vmem>>, vector<16x256xf32>,
    %c0_99 = arith.constant 0 : index
    %c0_100 = arith.constant 0 : index
    %82 = vector.load %arg8[%c0_99, %c0_100] : memref<16x256xf32, #tpu.memory_space<vmem>>, vector<16x256xf32>
    %c12_101 = arith.constant 12 : index
    %c0_102 = arith.constant 0 : index
    %c0_103 = arith.constant 0 : index
    %83 = vector.load %arg2[%c12_101, %c0_102, %c0_103] : memref<16x16x16xbf16, #tpu.memory_space<vmem>>, vector<1x16x16xbf16>
    %84 = vector.shape_cast %83 : vector<1x16x16xbf16> to vector<16x16xbf16>
    %c0_104 = arith.constant 0 : index
    %c30 = arith.constant 30 : index
    %85 = vector.load %arg1[%c0_104, %c30] : memref<16x384xbf16, #tpu.memory_space<vmem>>, vector<16x256xbf16>
    %cst_105 = arith.constant dense<0.000000e+00> : vector<16x256xf32>
    %86 = tpu.matmul %84, %85, %cst_105 {dimension_numbers = #tpu.dot_dimension_numbers<[1], [0], [0], [1], [0, 0, 1, 1], [], []>} : vector<16x16xbf16>, vector<16x256xbf16>, vector<16x256xf32> -> vector<16x256xf32>
    %87 = arith.addf %82, %86 : vector<16x256xf32>
    %c0_106 = arith.constant 0 : index
    %c0_107 = arith.constant 0 : index
    %88 = vector.load %arg8[%c0_106, %c0_107] : memref<16x256xf32, #tpu.memory_space<vmem>>, vector<16x256xf32>
    tpu.vector_store %arg8[%c0_106, %c0_107], %87 {strides = array<i32>} : memref<16x256xf32, #tpu.memory_space<vmem>>, vector<16x256xf32>,
    %c0_108 = arith.constant 0 : index
    %c0_109 = arith.constant 0 : index
    %89 = vector.load %arg8[%c0_108, %c0_109] : memref<16x256xf32, #tpu.memory_space<vmem>>, vector<16x256xf32>
    %c13_110 = arith.constant 13 : index
    %c0_111 = arith.constant 0 : index
    %c0_112 = arith.constant 0 : index
    %90 = vector.load %arg2[%c13_110, %c0_111, %c0_112] : memref<16x16x16xbf16, #tpu.memory_space<vmem>>, vector<1x16x16xbf16>
    %91 = vector.shape_cast %90 : vector<1x16x16xbf16> to vector<16x16xbf16>
    %c0_113 = arith.constant 0 : index
    %c31 = arith.constant 31 : index
    %92 = vector.load %arg1[%c0_113, %c31] : memref<16x384xbf16, #tpu.memory_space<vmem>>, vector<16x256xbf16>
    %cst_114 = arith.constant dense<0.000000e+00> : vector<16x256xf32>
    %93 = tpu.matmul %91, %92, %cst_114 {dimension_numbers = #tpu.dot_dimension_numbers<[1], [0], [0], [1], [0, 0, 1, 1], [], []>} : vector<16x16xbf16>, vector<16x256xbf16>, vector<16x256xf32> -> vector<16x256xf32>
    %94 = arith.addf %89, %93 : vector<16x256xf32>
    %c0_115 = arith.constant 0 : index
    %c0_116 = arith.constant 0 : index
    %95 = vector.load %arg8[%c0_115, %c0_116] : memref<16x256xf32, #tpu.memory_space<vmem>>, vector<16x256xf32>
    tpu.vector_store %arg8[%c0_115, %c0_116], %94 {strides = array<i32>} : memref<16x256xf32, #tpu.memory_space<vmem>>, vector<16x256xf32>,
    %c0_117 = arith.constant 0 : index
    %c0_118 = arith.constant 0 : index
    %96 = vector.load %arg8[%c0_117, %c0_118] : memref<16x256xf32, #tpu.memory_space<vmem>>, vector<16x256xf32>
    %c14 = arith.constant 14 : index
    %c0_119 = arith.constant 0 : index
    %c0_120 = arith.constant 0 : index
    %97 = vector.load %arg2[%c14, %c0_119, %c0_120] : memref<16x16x16xbf16, #tpu.memory_space<vmem>>, vector<1x16x16xbf16>
    %98 = vector.shape_cast %97 : vector<1x16x16xbf16> to vector<16x16xbf16>
    %c0_121 = arith.constant 0 : index
    %c32 = arith.constant 32 : index
    %99 = vector.load %arg1[%c0_121, %c32] : memref<16x384xbf16, #tpu.memory_space<vmem>>, vector<16x256xbf16>
    %cst_122 = arith.constant dense<0.000000e+00> : vector<16x256xf32>
    %100 = tpu.matmul %98, %99, %cst_122 {dimension_numbers = #tpu.dot_dimension_numbers<[1], [0], [0], [1], [0, 0, 1, 1], [], []>} : vector<16x16xbf16>, vector<16x256xbf16>, vector<16x256xf32> -> vector<16x256xf32>
    %101 = arith.addf %96, %100 : vector<16x256xf32>
    %c0_123 = arith.constant 0 : index
    %c0_124 = arith.constant 0 : index
    %102 = vector.load %arg8[%c0_123, %c0_124] : memref<16x256xf32, #tpu.memory_space<vmem>>, vector<16x256xf32>
    tpu.vector_store %arg8[%c0_123, %c0_124], %101 {strides = array<i32>} : memref<16x256xf32, #tpu.memory_space<vmem>>, vector<16x256xf32>,
    %c0_125 = arith.constant 0 : index
    %c0_126 = arith.constant 0 : index
    %103 = vector.load %arg8[%c0_125, %c0_126] : memref<16x256xf32, #tpu.memory_space<vmem>>, vector<16x256xf32>
    %c15 = arith.constant 15 : index
    %c0_127 = arith.constant 0 : index
    %c0_128 = arith.constant 0 : index
    %104 = vector.load %arg2[%c15, %c0_127, %c0_128] : memref<16x16x16xbf16, #tpu.memory_space<vmem>>, vector<1x16x16xbf16>
    %105 = vector.shape_cast %104 : vector<1x16x16xbf16> to vector<16x16xbf16>
    %c0_129 = arith.constant 0 : index
    %c33 = arith.constant 33 : index
    %106 = vector.load %arg1[%c0_129, %c33] : memref<16x384xbf16, #tpu.memory_space<vmem>>, vector<16x256xbf16>
    %cst_130 = arith.constant dense<0.000000e+00> : vector<16x256xf32>
    %107 = tpu.matmul %105, %106, %cst_130 {dimension_numbers = #tpu.dot_dimension_numbers<[1], [0], [0], [1], [0, 0, 1, 1], [], []>} : vector<16x16xbf16>, vector<16x256xbf16>, vector<16x256xf32> -> vector<16x256xf32>
    %108 = arith.addf %103, %107 : vector<16x256xf32>
    %c0_131 = arith.constant 0 : index
    %c0_132 = arith.constant 0 : index
    %109 = vector.load %arg8[%c0_131, %c0_132] : memref<16x256xf32, #tpu.memory_space<vmem>>, vector<16x256xf32>
    tpu.vector_store %arg8[%c0_131, %c0_132], %108 {strides = array<i32>} : memref<16x256xf32, #tpu.memory_space<vmem>>, vector<16x256xf32>,
    %c0_133 = arith.constant 0 : index
    %c0_134 = arith.constant 0 : index
    %110 = vector.load %arg8[%c0_133, %c0_134] : memref<16x256xf32, #tpu.memory_space<vmem>>, vector<16x256xf32>
    %c0_135 = arith.constant 0 : index
    %c0_136 = arith.constant 0 : index
    %111 = vector.load %arg3[%c0_135, %c0_136] : memref<16x1xf32, #tpu.memory_space<vmem>>, vector<16x1xf32>
    %112 = vector.broadcast %111 : vector<16x1xf32> to vector<16x256xf32>
    %113 = arith.addf %110, %112 : vector<16x256xf32>
    %c0_137 = arith.constant 0 : index
    %114 = memref.load %arg6[%c0_137] : memref<1xf32, #tpu.memory_space<smem>>
    %cst_138 = arith.constant 0.000000e+00 : f32
    %115 = vector.broadcast %cst_138 : f32 to vector<16x256xf32>
    %116 = arith.maximumf %113, %115 : vector<16x256xf32>
    %cst_139 = arith.constant 0.000000e+00 : f32
    %117 = vector.broadcast %cst_139 : f32 to vector<16x256xf32>
    %118 = arith.minimumf %113, %117 : vector<16x256xf32>
    %119 = vector.broadcast %114 : f32 to vector<16x256xf32>
    %120 = arith.mulf %119, %118 : vector<16x256xf32>
    %121 = arith.addf %116, %120 : vector<16x256xf32>
    %c0_140 = arith.constant 0 : index
    %c0_141 = arith.constant 0 : index
    %122 = vector.load %arg7[%c0_140, %c0_141] : memref<1x256xf32, #tpu.memory_space<vmem>>, vector<1x256xf32>
    %123 = vector.broadcast %122 : vector<1x256xf32> to vector<16x256xf32>
    %124 = arith.mulf %121, %123 : vector<16x256xf32>
    %cst_142 = arith.constant dense<0.000000e+00> : vector<16xf32>
    %125 = vector.multi_reduction <add>, %124, %cst_142 [1] : vector<16x256xf32> to vector<16xf32>
    %126 = vector.shape_cast %125 : vector<16xf32> to vector<16x1xf32>
    %cst_143 = arith.constant 0.0102040814 : f32
    %127 = vector.broadcast %cst_143 : f32 to vector<16x1xf32>
    %128 = arith.mulf %126, %127 : vector<16x1xf32>
    %129 = vector.broadcast %128 : vector<16x1xf32> to vector<16x256xf32>
    %130 = arith.subf %121, %129 : vector<16x256xf32>
    %131 = vector.broadcast %122 : vector<1x256xf32> to vector<16x256xf32>
    %132 = arith.mulf %130, %131 : vector<16x256xf32>
    %133 = arith.mulf %132, %132 : vector<16x256xf32>
    %cst_144 = arith.constant dense<0.000000e+00> : vector<16xf32>
    %134 = vector.multi_reduction <add>, %133, %cst_144 [1] : vector<16x256xf32> to vector<16xf32>
    %135 = vector.shape_cast %134 : vector<16xf32> to vector<16x1xf32>
    %cst_145 = arith.constant 0.0102040814 : f32
    %136 = vector.broadcast %cst_145 : f32 to vector<16x1xf32>
    %137 = arith.mulf %135, %136 : vector<16x1xf32>
    %cst_146 = arith.constant 9.99999974E-6 : f32
    %138 = vector.broadcast %cst_146 : f32 to vector<16x1xf32>
    %139 = arith.addf %137, %138 : vector<16x1xf32>
    %140 = math.rsqrt %139 : vector<16x1xf32>
    %141 = vector.broadcast %140 : vector<16x1xf32> to vector<16x256xf32>
    %142 = arith.mulf %132, %141 : vector<16x256xf32>
    %c0_147 = arith.constant 0 : index
    %c0_148 = arith.constant 0 : index
    %143 = vector.load %arg4[%c0_147, %c0_148] : memref<16x1xf32, #tpu.memory_space<vmem>>, vector<16x1xf32>
    %144 = vector.broadcast %143 : vector<16x1xf32> to vector<16x256xf32>
    %145 = arith.mulf %142, %144 : vector<16x256xf32>
    %c0_149 = arith.constant 0 : index
    %c0_150 = arith.constant 0 : index
    %146 = vector.load %arg5[%c0_149, %c0_150] : memref<16x1xf32, #tpu.memory_space<vmem>>, vector<16x1xf32>
    %147 = vector.broadcast %146 : vector<16x1xf32> to vector<16x256xf32>
    %148 = arith.addf %145, %147 : vector<16x256xf32>
    %c0_151 = arith.constant 0 : index
    %c0_152 = arith.constant 0 : index
    %149 = vector.load %arg8[%c0_151, %c0_152] : memref<16x256xf32, #tpu.memory_space<vmem>>, vector<16x256xf32>
    tpu.vector_store %arg8[%c0_151, %c0_152], %148 {strides = array<i32>} : memref<16x256xf32, #tpu.memory_space<vmem>>, vector<16x256xf32>,
    return
  }
  func.func @transform_0(%arg0: i32) -> (i32, i32) {
    %c0_i32 = arith.constant 0 : i32
    %c0_i32_0 = arith.constant 0 : i32
    %c0_i32_1 = arith.constant 0 : i32
    return %c0_i32, %c0_i32_0 : i32, i32
  }
  func.func @transform_1(%arg0: i32) -> (i32, i32, i32) {
    %c0_i32 = arith.constant 0 : i32
    %c0_i32_0 = arith.constant 0 : i32
    %c0_i32_1 = arith.constant 0 : i32
    return %c0_i32, %arg0, %c0_i32_0 : i32, i32, i32
  }
  func.func @transform_2(%arg0: i32) -> (i32, i32) {
    %c0_i32 = arith.constant 0 : i32
    %c0_i32_0 = arith.constant 0 : i32
    return %arg0, %c0_i32 : i32, i32
  }
  func.func @transform_3(%arg0: i32) -> (i32, i32) {
    %c0_i32 = arith.constant 0 : i32
    %c0_i32_0 = arith.constant 0 : i32
    return %arg0, %c0_i32 : i32, i32
  }
  func.func @transform_4(%arg0: i32) -> (i32, i32) {
    %c0_i32 = arith.constant 0 : i32
    %c0_i32_0 = arith.constant 0 : i32
    return %arg0, %c0_i32 : i32, i32
  }
  func.func @transform_5(%arg0: i32) -> i32 {
    %c0_i32 = arith.constant 0 : i32
    %c0_i32_0 = arith.constant 0 : i32
    return %c0_i32 : i32
  }
  func.func @transform_6(%arg0: i32) -> (i32, i32) {
    %c0_i32 = arith.constant 0 : i32
    %c0_i32_0 = arith.constant 0 : i32
    %c0_i32_1 = arith.constant 0 : i32
    return %c0_i32, %c0_i32_0 : i32, i32
  }
  func.func @transform_7(%arg0: i32) -> (i32, i32) {
    %c0_i32 = arith.constant 0 : i32
    %c0_i32_0 = arith.constant 0 : i32
    return %arg0, %c0_i32 : i32, i32
  }
}

</mosaic_0001>

<bundles_post_ra>
// kernel: tpu_custom_call.1
= control target key start
LH: loop header
LB: loop body
LE: loop exit
PB: predicated region body
PF: predicated region fallthrough
CT: control target
= control target key end

     0   :  { %s3069_s0 = inlined_call_operand.vmem [shape: bf16[16,384], index: 0, kind: input, shape index: {}]   ;;  %s3070_s1 = inlined_call_operand.vmem [shape: bf16[16,32,16], index: 1, kind: input, shape index: {}]   ;;  %s3071_s2 = inlined_call_operand.vmem [shape: f32[32,1], index: 2, kind: input, shape index: {}]   ;;  %s3072_s3 = inlined_call_operand.vmem [shape: f32[32,1], index: 3, kind: input, shape index: {}]   ;;  %s3073_s4 = inlined_call_operand.vmem [shape: f32[32,1], index: 4, kind: input, shape index: {}]   ;;  %s3074_s5 = inlined_call_operand.<no memory space> [shape: f32[1], index: 5, kind: input, shape index: {}]   ;;  %s3075_s6 = inlined_call_operand.vmem [shape: f32[1,256], index: 6, kind: input, shape index: {}]   ;;  %s3076_s7 = inlined_call_operand.hbm [shape: f32[32,256], index: 7, kind: output, shape index: {}]  }
   0x1   :  { %12 = sst [smem:[#allocation2]] %s3074_s5 }
   0x2   :  { %13 = vsyncpa [#allocation5], 0 }
   0x3   :  { %15 = vsyncpa [#allocation5 + $0x1], 0  ;;  %s2604_s26 = smov 0   ;;  %s2606_s27 = smov 0  }
   0x4   :  { %s2608_s28 = smov 0   ;;  %s2610_s29 = smov 0  }
   0x5 LB: > { %s2625_s5 = sadd.s32 4294967295, %s2541_s29   ;;  %s2014_s30 = sadd.s32 4294967294, %s2541_s29   ;;  %s2541_s29 = sphi %s2610_s29, %s3082_s29   ;;  %s2537_s28 = sphi %s2608_s28, %s3081_s28   ;;  %s2533_s27 = sphi %s2606_s27, %s3080_s27   ;;  %s2529_s26 = sphi %s2604_s26, %s3079_s26  }
   0x6   : > { %s2629_s8 = sadd.s32 1, %s2541_s29   ;;  %s49_s9 = sadd.s32 1, %s2537_s28 }
   0x7   : > { %s46_s10 = ssub.s32 %s2541_s29, %s2629_s8  ;;  %p56_p0 = scmp.ne.s32.totalorder %s2537_s28, %s2533_s27 }
   0x8   : > { %p47_p1 = scmp.eq.s32.totalorder %s46_s10, 0  ;;  %p57_p2 = scmp.eq.s32.totalorder %s2541_s29, 0 }
   0x9   : > { %p206_p3 = scmp.eq.s32.totalorder %s2625_s5, 1  ;;  %p211_p4 = scmp.ne.s32.totalorder %s2533_s27, %s2529_s26 }
   0xa   : > { %s2641_s11 = scalar_select %p47_p1, %s2537_s28, %s49_s9  }
   0xb   : > { %p58_p5 = por %p57_p2, %p56_p0  ;;  %p2643_p6 = por %p206_p3, %p56_p0 }
   0xc   : > { %p212_p7 = scmp.eq.s32.totalorder %s2014_s30, 1  ;;  %p2016_p9 = scmp.ge.s32.totalorder %s2541_s29, 2 }
   0xe   : > { %p2647_p8 = por %p212_p7, %p211_p4  ;;  %237 = sbr.rel (%p2016_p9) target bundleno = 39 (0x27), region = 28 }
  0x13   : > { %240 = sbr.rel (!%p58_p5) target bundleno = 39 (0x27), region = 32  ;;  %s242_s14 = sand.u32 (%p58_p5), 1, %s2537_s28  }
  0x14   : > { %s2349_s15 = sshll.u32 (%p58_p5), %s2541_s29, 3  ;;  %s2017_s16 = sshll.u32 (%p58_p5), %s242_s14, 7 }
  0x15   : > { %s2659_s19 = scalar_lea.vmem (%p58_p5), %s3070_s1, %s2349_s15  ;;  %s244_s20 = scalar_lea.vmem (%p58_p5), [#allocation3], %s2017_s16 }
  0x16   : > { %v264_v0 = vld [vmem:[%s2659_s19] sm:$0xff] (%p58_p5)   ;;  %v268_v1 = vld [vmem:[%s2659_s19 + $0x10] sm:$0xff] (%p58_p5)  }
  0x17   : > { %v272_v2 = vld [vmem:[%s2659_s19 + $0x20] sm:$0xff] (%p58_p5)   ;;  %265 = vst [vmem:[%s244_s20] sm:$0xff] (%p58_p5), %v264_v0   ;;  %v276_v3 = vld [vmem:[%s2659_s19 + $0x30] sm:$0xff] (%p58_p5)  }
  0x18   : > { %269 = vst [vmem:[%s244_s20 + $0x8] sm:$0xff] %v268_v1   ;;  %v280_v4 = vld [vmem:[%s2659_s19 + $0x40] sm:$0xff]   ;;  %v284_v5 = vld [vmem:[%s2659_s19 + $0x50] sm:$0xff]  }
  0x19   : > { %273 = vst [vmem:[%s244_s20 + $0x10] sm:$0xff] %v272_v2   ;;  %v288_v6 = vld [vmem:[%s2659_s19 + $0x60] sm:$0xff]   ;;  %v292_v7 = vld [vmem:[%s2659_s19 + $0x70] sm:$0xff]  }
  0x1a   : > { %277 = vst [vmem:[%s244_s20 + $0x18] sm:$0xff] %v276_v3   ;;  %v296_v8 = vld [vmem:[%s2659_s19 + $0x80] sm:$0xff]   ;;  %v300_v9 = vld [vmem:[%s2659_s19 + $0x90] sm:$0xff]  }
  0x1b   : > { %281 = vst [vmem:[%s244_s20 + $0x20] sm:$0xff] %v280_v4   ;;  %v304_v10 = vld [vmem:[%s2659_s19 + $0xa0] sm:$0xff]   ;;  %v308_v11 = vld [vmem:[%s2659_s19 + $0xb0] sm:$0xff]  }
  0x1c   : > { %285 = vst [vmem:[%s244_s20 + $0x28] sm:$0xff] %v284_v5   ;;  %v312_v12 = vld [vmem:[%s2659_s19 + $0xc0] sm:$0xff]   ;;  %v316_v13 = vld [vmem:[%s2659_s19 + $0xd0] sm:$0xff]  }
  0x1d   : > { %289 = vst [vmem:[%s244_s20 + $0x30] sm:$0xff] %v288_v6   ;;  %v320_v14 = vld [vmem:[%s2659_s19 + $0xe0] sm:$0xff]   ;;  %v324_v15 = vld [vmem:[%s2659_s19 + $0xf0] sm:$0xff]  }
  0x1e   : > { %293 = vst [vmem:[%s244_s20 + $0x38] sm:$0xff] %v292_v7  }
  0x1f   : > { %297 = vst [vmem:[%s244_s20 + $0x40] sm:$0xff] %v296_v8  }
  0x20   : > { %301 = vst [vmem:[%s244_s20 + $0x48] sm:$0xff] %v300_v9  }
  0x21   : > { %305 = vst [vmem:[%s244_s20 + $0x50] sm:$0xff] %v304_v10  }
  0x22   : > { %309 = vst [vmem:[%s244_s20 + $0x58] sm:$0xff] %v308_v11  }
  0x23   : > { %313 = vst [vmem:[%s244_s20 + $0x60] sm:$0xff] %v312_v12  }
  0x24   : > { %317 = vst [vmem:[%s244_s20 + $0x68] sm:$0xff] %v316_v13  }
  0x25   : > { %321 = vst [vmem:[%s244_s20 + $0x70] sm:$0xff] %v320_v14  }
  0x26   : > { %325 = vst [vmem:[%s244_s20 + $0x78] sm:$0xff] %v324_v15  }
  0x27 PF: > { %p2020_p10 = scmp.ge.s32.totalorder %s2541_s29, 1  ;;  %p441_p11 = scmp.lt.s32.totalorder %s2541_s29, 3 }
  0x29   : > { %p442_p12 = pnand %p2020_p10, %p441_p11 }
  0x2a   : > { %s2543_s14 = smov (!%p442_p12), 127   ;;  %s2544_s9 = smov (!%p442_p12), 126  }
  0x2b   : > { %445 = sbr.rel (%p442_p12) target bundleno = 720 (0x2d0), region = 85  ;;  %s2545_s16 = smov (!%p442_p12), 125  }
  0x2c   : > { %s2546_s10 = smov (!%p442_p12), 118   ;;  %s2547_s30 = smov (!%p442_p12), 117  }
  0x2d   : > { %s2548_s24 = smov (!%p442_p12), 116   ;;  %s2549_s22 = smov (!%p442_p12), 115  }
  0x2e   : > { %s2550_s20 = smov (!%p442_p12), 108   ;;  %s2551_s19 = smov (!%p442_p12), 107  }
  0x2f   : > { %s2552_s18 = smov (!%p442_p12), 106   ;;  %s2499_s15 = scalar_lea.hbm (!%p442_p12), %s3076_s7, 64 }
  0x30   : > { %v2059_v16 = vld [vmem:[%s3069_s0 + $0x8] sm:$0xf]  ;;  %v2356_v17 = vld [vmem:[%s3069_s0 + $0x10] sm:$0xf0]  ;;  %v2051_v19 = vld [vmem:[%s3069_s0] sm:$0xf] }
  0x31   : > { %v2060_v18 = vor.u32 %v2356_v17, %v2059_v16  ;;  %v2355_v20 = vld [vmem:[%s3069_s0 + $0x8] sm:$0xf0]  ;;  %v2358_v22 = vld [vmem:[%s3069_s0 + $0x4] sm:$0xf]  ;;  %v2073_v23 = vld [vmem:[%s3069_s0 + $0xc] sm:$0xf0] }
  0x32   : > { %v2052_v21 = vor.u32 %v2355_v20, %v2051_v19  ;;  %v2071_v24 = vld [vmem:[%s3069_s0] sm:$0xf]  ;;  %v2359_v25 = vld [vmem:[%s3069_s0 + $0x8] sm:$0xf0]  ;;  %v2076_v26 = vor.u32 %v2358_v22, %v2073_v23  ;;  %v2354_v27 = vld [vmem:[%s3069_s0 + $0x4] sm:$0xf] }
  0x33   : > { %603 = vrot.lane.b32.xlu1 %v2060_v18, %s2543_s14  ;;  %v2053_v28 = vld [vmem:[%s3069_s0 + $0xc] sm:$0xf0]  ;;  %v2072_v29 = vor.u32 %v2359_v25, %v2071_v24  ;;  %v2079_v30 = vld [vmem:[%s3069_s0 + $0x8] sm:$0xf]  ;;  %v2360_v31 = vld [vmem:[%s3069_s0 + $0x10] sm:$0xf0] }
  0x34   : > { %599 = vrot.lane.b32.xlu0 %v2052_v21, %s2543_s14  ;;  %680 = vrot.lane.b32.xlu2 %v2076_v26, %s2544_s9  ;;  %v2056_v32 = vor.u32 %v2354_v27, %v2053_v28  ;;  %v2080_v33 = vor.u32 %v2360_v31, %v2079_v30  ;;  %v2362_v34 = vld [vmem:[%s3069_s0 + $0x4] sm:$0xf]  ;;  %v2093_v35 = vld [vmem:[%s3069_s0 + $0xc] sm:$0xf0]  ;;  %vm534_vm0 = vcmask 130048   ;;  %vm684_vm1 = vcmask 1031168  }
  0x35   : > { %v2091_v36 = vld [vmem:[%s3069_s0] sm:$0xf]  ;;  %v2363_v37 = vld [vmem:[%s3069_s0 + $0x8] sm:$0xf0]  ;;  %v2096_v38 = vor.u32 %v2362_v34, %v2093_v35  ;;  %v2099_v39 = vld [vmem:[%s3069_s0 + $0x8] sm:$0xf] }
  0x36   : > { %v2364_v40 = vld [vmem:[%s3069_s0 + $0x10] sm:$0xf0]  ;;  %v2092_v41 = vor.u32 %v2363_v37, %v2091_v36  ;;  %v2366_v43 = vld [vmem:[%s3069_s0 + $0x4] sm:$0xf]  ;;  %v2113_v44 = vld [vmem:[%s3069_s0 + $0xc] sm:$0xf0] }
  0x37   : > { %v2100_v42 = vor.u32 %v2364_v40, %v2099_v39  ;;  %v2111_v45 = vld [vmem:[%s3069_s0] sm:$0xf]  ;;  %v2367_v46 = vld [vmem:[%s3069_s0 + $0x8] sm:$0xf0]  ;;  %v2116_v47 = vor.u32 %v2366_v43, %v2113_v44  ;;  %v2119_v48 = vld [vmem:[%s3069_s0 + $0x8] sm:$0xf] }
  0x38   : > { %v2368_v49 = vld [vmem:[%s3069_s0 + $0x10] sm:$0xf0]  ;;  %v2112_v50 = vor.u32 %v2367_v46, %v2111_v45  ;;  %v2370_v52 = vld [vmem:[%s3069_s0 + $0x4] sm:$0xf]  ;;  %v2133_v53 = vld [vmem:[%s3069_s0 + $0xc] sm:$0xf0] }
  0x39   : > { %v2120_v51 = vor.u32 %v2368_v49, %v2119_v48  ;;  %v2131_v54 = vld [vmem:[%s3069_s0] sm:$0xf]  ;;  %v2371_v55 = vld [vmem:[%s3069_s0 + $0x8] sm:$0xf0]  ;;  %v2136_v56 = vor.u32 %v2370_v52, %v2133_v53  ;;  %v2139_v57 = vld [vmem:[%s3069_s0 + $0x8] sm:$0xf] }
  0x3a   : > { %v2372_v58 = vld [vmem:[%s3069_s0 + $0x10] sm:$0xf0]  ;;  %v2132_v59 = vor.u32 %v2371_v55, %v2131_v54  ;;  %v2374_v61 = vld [vmem:[%s3069_s0 + $0x4] sm:$0xf]  ;;  %v2153_v62 = vld [vmem:[%s3069_s0 + $0xc] sm:$0xf0] }
  0x3b   : > { %678 = vrot.lane.b32.xlu1 %v2072_v29, %s2544_s9  ;;  %v2140_v60 = vor.u32 %v2372_v58, %v2139_v57  ;;  %v2151_v63 = vld [vmem:[%s3069_s0] sm:$0xf]  ;;  %v2375_v0 = vld [vmem:[%s3069_s0 + $0x8] sm:$0xf0]  ;;  %v2156_v1 = vor.u32 %v2374_v61, %v2153_v62  ;;  %v2159_v2 = vld [vmem:[%s3069_s0 + $0x8] sm:$0xf] }
  0x3c   : > { %601 = vrot.lane.b32.xlu0 %v2056_v32, %s2543_s14  ;;  %682 = vrot.lane.b32.xlu2 %v2080_v33, %s2544_s9  ;;  %v2376_v3 = vld [vmem:[%s3069_s0 + $0x10] sm:$0xf0]  ;;  %v2152_v4 = vor.u32 %v2375_v0, %v2151_v63  ;;  %v2378_v6 = vld [vmem:[%s3069_s0 + $0x4] sm:$0xf]  ;;  %s2872_s14 = sand.u32 1, %s2533_s27   ;;  %vm605_vm2 = vcmask 1039360  }
  0x3d   : > { %v2160_v5 = vor.u32 %v2376_v3, %v2159_v2  ;;  %v2173_v7 = vld [vmem:[%s3069_s0 + $0xc] sm:$0xf0]  ;;  %v2171_v8 = vld [vmem:[%s3069_s0] sm:$0xf]  ;;  %v2379_v9 = vld [vmem:[%s3069_s0 + $0x8] sm:$0xf0] }
  0x3e   : > { %v2176_v10 = vor.u32 %v2378_v6, %v2173_v7  ;;  %v2179_v11 = vld [vmem:[%s3069_s0 + $0x8] sm:$0xf]  ;;  %v2380_v12 = vld [vmem:[%s3069_s0 + $0x10] sm:$0xf0]  ;;  %v2172_v13 = vor.u32 %v2379_v9, %v2171_v8  ;;  %v2382_v15 = vld [vmem:[%s3069_s0 + $0x4] sm:$0xf] }
  0x3f   : > { %v2180_v14 = vor.u32 %v2380_v12, %v2179_v11  ;;  %v2193_v16 = vld [vmem:[%s3069_s0 + $0xc] sm:$0xf0]  ;;  %v2191_v17 = vld [vmem:[%s3069_s0] sm:$0xf]  ;;  %v2383_v18 = vld [vmem:[%s3069_s0 + $0x8] sm:$0xf0] }
  0x40   : > { %v2196_v19 = vor.u32 %v2382_v15, %v2193_v16  ;;  %v2199_v20 = vld [vmem:[%s3069_s0 + $0x8] sm:$0xf]  ;;  %v2384_v21 = vld [vmem:[%s3069_s0 + $0x10] sm:$0xf0]  ;;  %v2192_v22 = vor.u32 %v2383_v18, %v2191_v17  ;;  %v2386_v24 = vld [vmem:[%s3069_s0 + $0x4] sm:$0xf] }
  0x41   : > { %v2200_v23 = vor.u32 %v2384_v21, %v2199_v20  ;;  %v2213_v25 = vld [vmem:[%s3069_s0 + $0xc] sm:$0xf0]  ;;  %v2211_v26 = vld [vmem:[%s3069_s0] sm:$0xf]  ;;  %v2387_v27 = vld [vmem:[%s3069_s0 + $0x8] sm:$0xf0] }
  0x42   : > { %v2216_v28 = vor.u32 %v2386_v24, %v2213_v25  ;;  %v2219_v29 = vld [vmem:[%s3069_s0 + $0x8] sm:$0xf]  ;;  %v2388_v30 = vld [vmem:[%s3069_s0 + $0x10] sm:$0xf0]  ;;  %v2212_v31 = vor.u32 %v2387_v27, %v2211_v26  ;;  %v2390_v33 = vld [vmem:[%s3069_s0 + $0x4] sm:$0xf] }
  0x43   : > { %759 = vrot.lane.b32.xlu1 %v2096_v38, %s2545_s16  ;;  %v2220_v32 = vor.u32 %v2388_v30, %v2219_v29  ;;  %v2233_v34 = vld [vmem:[%s3069_s0 + $0xc] sm:$0xf0]  ;;  %v2231_v35 = vld [vmem:[%s3069_s0] sm:$0xf]  ;;  %v2391_v36 = vld [vmem:[%s3069_s0 + $0x8] sm:$0xf0] }
  0x44   : > { %757 = vrot.lane.b32.xlu0 %v2092_v41, %s2545_s16  ;;  %761 = vrot.lane.b32.xlu2 %v2100_v42, %s2545_s16  ;;  %v2236_v37 = vor.u32 %v2390_v33, %v2233_v34  ;;  %v2239_v38 = vld [vmem:[%s3069_s0 + $0x8] sm:$0xf]  ;;  %v2392_v39 = vld [vmem:[%s3069_s0 + $0x10] sm:$0xf0]  ;;  %v2232_v40 = vor.u32 %v2391_v36, %v2231_v35  ;;  %s2553_s16 = smov 105   ;;  %vm763_vm3 = vcmask 1022976  }
  0x45   : > { %v2240_v41 = vor.u32 %v2392_v39, %v2239_v38  ;;  %v2394_v42 = vld [vmem:[%s3069_s0 + $0x4] sm:$0xf]  ;;  %v2253_v43 = vld [vmem:[%s3069_s0 + $0xc] sm:$0xf0]  ;;  %v2251_v44 = vld [vmem:[%s3069_s0] sm:$0xf] }
  0x46   : > { %v2395_v45 = vld [vmem:[%s3069_s0 + $0x8] sm:$0xf0]  ;;  %v2256_v46 = vor.u32 %v2394_v42, %v2253_v43  ;;  %v2259_v48 = vld [vmem:[%s3069_s0 + $0x8] sm:$0xf]  ;;  %v2396_v49 = vld [vmem:[%s3069_s0 + $0x10] sm:$0xf0] }
  0x47   : > { %v2273_v52 = vld [vmem:[%s3069_s0 + $0xc] sm:$0xf0]  ;;  %v2271_v53 = vld [vmem:[%s3069_s0] sm:$0xf]  ;;  %v2399_v54 = vld [vmem:[%s3069_s0 + $0x8] sm:$0xf0] }
  0x48   : > { %v2035_v55 = vld [vmem:[%s3069_s0] sm:$0xf]  ;;  %v2351_v57 = vld [vmem:[%s3069_s0 + $0x4] sm:$0xf]  ;;  %v2272_v63 = vor.u32 %v2399_v54, %v2271_v53  ;;  %v2279_v0 = vld [vmem:[%s3069_s0 + $0x8] sm:$0xf] }
  0x49   : > { %v2402_v3 = vld [vmem:[%s3069_s0 + $0x4] sm:$0xf]  ;;  %v2403_v6 = vld [vmem:[%s3069_s0 + $0x8] sm:$0xf0]  ;;  %v2404_v11 = vld [vmem:[%s3069_s0 + $0x10] sm:$0xf0] }
  0x4a   : > { %v2311_v15 = vld [vmem:[%s3069_s0] sm:$0xf]  ;;  %v2407_v16 = vld [vmem:[%s3069_s0 + $0x8] sm:$0xf0]  ;;  %v2410_v25 = vld [vmem:[%s3069_s0 + $0x4] sm:$0xf] }
  0x4b   : > { %838 = vrot.lane.b32.xlu1 %v2116_v47, %s2546_s10  ;;  %v2252_v47 = vor.u32 %v2395_v45, %v2251_v44  ;;  %v2333_v26 = vld [vmem:[%s3069_s0 + $0xc] sm:$0xf0]  ;;  %v2331_v27 = vld [vmem:[%s3069_s0] sm:$0xf]  ;;  %v2412_v33 = vld [vmem:[%s3069_s0 + $0x10] sm:$0xf0] }
  0x4c   : > { %836 = vrot.lane.b32.xlu0 %v2112_v50, %s2546_s10  ;;  %840 = vrot.lane.b32.xlu2 %v2120_v51, %s2546_s10  ;;  %v2260_v50 = vor.u32 %v2396_v49, %v2259_v48  ;;  %v2398_v51 = vld [vmem:[%s3069_s0 + $0x4] sm:$0xf]  ;;  %v2336_v29 = vor.u32 %v2410_v25, %v2333_v26  ;;  %vm842_vm4 = vcmask 965632   ;;  %vm921_vm5 = vcmask 957440  }
  0x4d   : > { %vm1000_vm6 = vcmask 949248   ;;  %vm1079_vm7 = vcmask 941056   ;;  %vm1158_vm8 = vcmask 883712   ;;  %vm1237_vm9 = vcmask 875520  }
  0x4e   : > { %vm1316_vm10 = vcmask 867328   ;;  %vm1395_vm11 = vcmask 859136   ;;  %vm1474_vm12 = vcmask 801792   ;;  %vm1553_vm13 = vcmask 793600  }
  0x4f   : > { %vm1632_vm14 = vcmask 785408   ;;  %vm1711_vm15 = vcmask 777216  }
  0x53   : > { %917 = vrot.lane.b32.xlu1 %v2136_v56, %s2547_s30  ;;  %v2352_v56 = vld [vmem:[%s3069_s0 + $0x8] sm:$0xf0] }
  0x54   : > { %915 = vrot.lane.b32.xlu0 %v2132_v59, %s2547_s30  ;;  %919 = vrot.lane.b32.xlu2 %v2140_v60, %s2547_s30  ;;  %v2036_v58 = vor.u32 %v2352_v56, %v2035_v55  ;;  %v2037_v59 = vld [vmem:[%s3069_s0 + $0xc] sm:$0xf0]  ;;  %v2276_v60 = vor.u32 %v2398_v51, %v2273_v52  ;;  %s2556_s30 = smov 96  }
  0x55   : > { %v2040_v61 = vor.u32 %v2351_v57, %v2037_v59 }
  0x56   : > { %545 = vmatpush.bf16.msra.mxu0 %v2036_v58 }
  0x57   : > { %559 = vmatpush.bf16.msra.mxu1 %v2040_v61 }
  0x5b   : > { %996 = vrot.lane.b32.xlu1 %v2156_v1, %s2548_s24  ;;  %v2400_v1 = vld [vmem:[%s3069_s0 + $0x10] sm:$0xf0] }
  0x5c   : > { %994 = vrot.lane.b32.xlu0 %v2152_v4, %s2548_s24  ;;  %998 = vrot.lane.b32.xlu2 %v2160_v5, %s2548_s24  ;;  %s2021_s24 = sshll.u32 %s2872_s14, 7  ;;  %v2280_v2 = vor.u32 %v2400_v1, %v2279_v0  ;;  %v2293_v4 = vld [vmem:[%s3069_s0 + $0xc] sm:$0xf0]  ;;  %v2291_v5 = vld [vmem:[%s3069_s0] sm:$0xf] }
  0x5d   : > { %s2905_s23 = scalar_lea.vmem [#allocation3], %s2021_s24  ;;  %v2296_v7 = vor.u32 %v2402_v3, %v2293_v4  ;;  %v2292_v9 = vor.u32 %v2403_v6, %v2291_v5  ;;  %s2555_s24 = smov 97  }
  0x5e   : > { %v2350_v62 = vld [vmem:[%s2905_s23] sm:$0xff]  ;;  %v2357_v21 = vld [vmem:[%s2905_s23 + $0x10] sm:$0xff]  ;;  %v2353_v43 = vld [vmem:[%s2905_s23 + $0x8] sm:$0xff] }
  0x5f   : > { %2041 = vmatmul.msk.bf16.vlgmr.msra.gmra.mxu0 %vm534_vm0, %v2350_v62  ;;  %2042 = vmatmul.msk.bf16.vlgmr.msra.gmra.mxu1 %vm534_vm0, %v2350_v62  ;;  %v2365_v53 = vld [vmem:[%s2905_s23 + $0x20] sm:$0xff]  ;;  %v2361_v55 = vld [vmem:[%s2905_s23 + $0x18] sm:$0xff]  ;;  %v2373_v1 = vld [vmem:[%s2905_s23 + $0x30] sm:$0xff] }
  0x60   : > { %v2385_v25 = vld [vmem:[%s2905_s23 + $0x48] sm:$0xff] }
  0x63   : > { %1075 = vrot.lane.b32.xlu1 %v2176_v10, %s2549_s22  ;;  %v2299_v10 = vld [vmem:[%s3069_s0 + $0x8] sm:$0xf] }
  0x64   : > { %1073 = vrot.lane.b32.xlu0 %v2172_v13, %s2549_s22  ;;  %1077 = vrot.lane.b32.xlu2 %v2180_v14, %s2549_s22  ;;  %v2300_v12 = vor.u32 %v2404_v11, %v2299_v10  ;;  %v2406_v13 = vld [vmem:[%s3069_s0 + $0x4] sm:$0xf]  ;;  %v2313_v14 = vld [vmem:[%s3069_s0 + $0xc] sm:$0xf0] }
  0x65   : > { %v2316_v17 = vor.u32 %v2406_v13, %v2313_v14  ;;  %v2377_v13 = vld [vmem:[%s2905_s23 + $0x38] sm:$0xff] }
  0x6b   : > { %1154 = vrot.lane.b32.xlu1 %v2196_v19, %s2550_s20  ;;  %v2312_v19 = vor.u32 %v2407_v16, %v2311_v15 }
  0x6c   : > { %1152 = vrot.lane.b32.xlu0 %v2192_v22, %s2550_s20  ;;  %1156 = vrot.lane.b32.xlu2 %v2200_v23, %s2550_s20  ;;  %v2319_v22 = vld [vmem:[%s3069_s0 + $0x8] sm:$0xf]  ;;  %v2408_v23 = vld [vmem:[%s3069_s0 + $0x10] sm:$0xf0] }
  0x6d   : > { %v2320_v24 = vor.u32 %v2408_v23, %v2319_v22 }
  0x73   : > { %1233 = vrot.lane.b32.xlu1 %v2216_v28, %s2551_s19  ;;  %v2411_v28 = vld [vmem:[%s3069_s0 + $0x8] sm:$0xf0] }
  0x74   : > { %1231 = vrot.lane.b32.xlu0 %v2212_v31, %s2551_s19  ;;  %1235 = vrot.lane.b32.xlu2 %v2220_v32, %s2551_s19  ;;  %v2332_v31 = vor.u32 %v2411_v28, %v2331_v27  ;;  %v2339_v32 = vld [vmem:[%s3069_s0 + $0x8] sm:$0xf] }
  0x75   : > { %v2340_v34 = vor.u32 %v2412_v33, %v2339_v32 }
  0x7b   : > { %1312 = vrot.lane.b32.xlu1 %v2236_v37, %s2552_s18 }
  0x7c   : > { %1310 = vrot.lane.b32.xlu0 %v2232_v40, %s2552_s18  ;;  %1314 = vrot.lane.b32.xlu2 %v2240_v41, %s2552_s18  ;;  %s1894_s18 = scalar_lea.sflag [#allocation5], %s2872_s14 }
  0x83   : > { %1391 = vrot.lane.b32.xlu1 %v2256_v46, %s2553_s16 }
  0x84   : > { %1389 = vrot.lane.b32.xlu0 %v2252_v47, %s2553_s16  ;;  %1393 = vrot.lane.b32.xlu2 %v2260_v50, %s2553_s16  ;;  %s2554_s16 = smov 98  }
  0x8b   : > { %1470 = vrot.lane.b32.xlu1 %v2276_v60, %s2554_s16 }
  0x8c   : > { %1468 = vrot.lane.b32.xlu0 %v2272_v63, %s2554_s16  ;;  %1472 = vrot.lane.b32.xlu2 %v2280_v2, %s2554_s16  ;;  %v2369_v2 = vld [vmem:[%s2905_s23 + $0x28] sm:$0xff] }
  0x8e   : > { %v681_v8 = vpop.permute.xlu2 %680 }
  0x93   : > { %1549 = vrot.lane.b32.xlu1 %v2296_v7, %s2555_s24 }
  0x94   : > { %1547 = vrot.lane.b32.xlu0 %v2292_v9, %s2555_s24  ;;  %1551 = vrot.lane.b32.xlu2 %v2300_v12, %s2555_s24  ;;  %s2557_s24 = smov 95   ;;  %v2381_v12 = vld [vmem:[%s2905_s23 + $0x40] sm:$0xff] }
  0x96   : > { %v683_v18 = vpop.permute.xlu2 %682 }
  0x97   : > { %v686_v20 = vsel %vm684_vm1, %v681_v8, %v683_v18 }
  0x98   : > { %713 = vmatpush.bf16.msrb.mxu1 %v686_v20 }
  0x9b   : > { %1628 = vrot.lane.b32.xlu1 %v2316_v17, %s2556_s30  ;;  %2082 = vmatmul.msk.bf16.vlgmr.msrb.gmra.mxu1 %vm534_vm0, %v2357_v21 }
  0x9c   : > { %1626 = vrot.lane.b32.xlu0 %v2312_v19, %s2556_s30  ;;  %1630 = vrot.lane.b32.xlu2 %v2320_v24, %s2556_s30  ;;  %v2389_v24 = vld [vmem:[%s2905_s23 + $0x50] sm:$0xff]  ;;  %s2023_s30 = sshll.u32 %s2625_s5, 1 }
  0x9d   : > { %p496_p13 = scmp.lt.s32.totalorder %s2023_s30, 3 }
  0x9e   : > { %v762_v30 = vpop.permute.xlu2 %761 }
  0x9f   : > { %s3084_s30 = smov (!%p496_p13, %s2023_s30), 3 }
  0xa0   : > { %s3011_s17 = sshll.u32 %s3084_s30, 3  ;;  %s2022_s30 = sshll.u32 %s2872_s14, 5 }
  0xa1   : > { %s499_s9 = scalar_lea.vmem %s3071_s2, %s3011_s17  ;;  %s505_s25 = scalar_lea.vmem %s3072_s3, %s3011_s17 }
  0xa3   : > { %1707 = vrot.lane.b32.xlu1 %v2336_v29, %s2557_s24 }
  0xa4   : > { %1705 = vrot.lane.b32.xlu0 %v2332_v31, %s2557_s24  ;;  %1709 = vrot.lane.b32.xlu2 %v2340_v34, %s2557_s24  ;;  %s511_s24 = scalar_lea.vmem %s3073_s4, %s3011_s17  ;;  %s2414_s17 = sshll.u32 %s2625_s5, 5 }
  0xa5   : > { %v604_v35 = vpop.permute.xlu1 %603 }
  0xa6   : > { %v600_v36 = vpop.permute.xlu0 %599  ;;  %v841_v37 = vpop.permute.xlu2 %840 }
  0xad   : > { %v679_v38 = vpop.permute.xlu1 %678 }
  0xae   : > { %v602_v39 = vpop.permute.xlu0 %601  ;;  %v685_v40 = vsel %vm684_vm1, %v679_v38, %v681_v8  ;;  %v920_v44 = vpop.permute.xlu2 %919 }
  0xaf   : > { %v606_v41 = vsel %vm605_vm2, %v600_v36, %v602_v39  ;;  %v607_v42 = vsel %vm605_vm2, %v602_v39, %v604_v35  ;;  %699 = vmatpush.bf16.msrb.mxu0 %v685_v40  ;;  %v2397_v35 = vld [vmem:[%s2905_s23 + $0x60] sm:$0xff]  ;;  %v2393_v36 = vld [vmem:[%s2905_s23 + $0x58] sm:$0xff] }
  0xb0   : > { %620 = vmatpush.bf16.msra.mxu2 %v606_v41  ;;  %634 = vmatpush.bf16.msra.mxu3 %v607_v42 }
  0xb2   : > { %2081 = vmatmul.msk.bf16.vlgmr.msrb.gmra.mxu0 %vm534_vm0, %v2357_v21 }
  0xb3   : > { %2061 = vmatmul.msk.bf16.vlgmr.msra.gmra.mxu2 %vm534_vm0, %v2353_v43  ;;  %2062 = vmatmul.msk.bf16.vlgmr.msra.gmra.mxu3 %vm534_vm0, %v2353_v43 }
  0xb5   : > { %v760_v45 = vpop.permute.xlu1 %759 }
  0xb6   : > { %v758_v46 = vpop.permute.xlu0 %757  ;;  %v765_v47 = vsel %vm763_vm3, %v760_v45, %v762_v30  ;;  %v999_v49 = vpop.permute.xlu2 %998 }
  0xb7   : > { %v764_v48 = vsel %vm763_vm3, %v758_v46, %v760_v45  ;;  %792 = vmatpush.bf16.msrb.mxu3 %v765_v47  ;;  %v2405_v47 = vld [vmem:[%s2905_s23 + $0x70] sm:$0xff] }
  0xb8   : > { %778 = vmatpush.bf16.msrb.mxu2 %v764_v48  ;;  %v2401_v48 = vld [vmem:[%s2905_s23 + $0x68] sm:$0xff] }
  0xbd   : > { %v839_v50 = vpop.permute.xlu1 %838 }
  0xbe   : > { %v844_v51 = vsel %vm842_vm4, %v839_v50, %v841_v37  ;;  %v837_v52 = vpop.permute.xlu0 %836  ;;  %v1078_v56 = vpop.permute.xlu2 %1077 }
  0xbf   : > { %v843_v54 = vsel %vm842_vm4, %v837_v52, %v839_v50  ;;  %871 = vmatpush.bf16.msra.mxu1 %v844_v51  ;;  %v2558_v52 = vmov 0  }
  0xc0   : > { %857 = vmatpush.bf16.msra.mxu0 %v843_v54  ;;  %2472 = vset.pattern.permute.xlu0 %v2558_v52 }
  0xc1   : > { %2473 = vset.pattern.permute.xlu1 %v2558_v52  ;;  %2474 = vset.pattern.permute.xlu2 %v2558_v52 }
  0xc2   : > { %2122 = vmatmul.msk.bf16.vlgmr.msra.gmra.mxu1 %vm534_vm0, %v2365_v53 }
  0xc3   : > { %2101 = vmatmul.msk.bf16.vlgmr.msrb.gmra.mxu2 %vm534_vm0, %v2361_v55  ;;  %2102 = vmatmul.msk.bf16.vlgmr.msrb.gmra.mxu3 %vm534_vm0, %v2361_v55 }
  0xc4   : > { %2121 = vmatmul.msk.bf16.vlgmr.msra.gmra.mxu0 %vm534_vm0, %v2365_v53  ;;  %v1759_v53 = vld [vmem:[%s499_s9] sm:$0xff] }
  0xc5   : > { %v918_v57 = vpop.permute.xlu1 %917  ;;  %1763 = vperm.xlu0 %2472, %v1759_v53  }
  0xc6   : > { %v923_v58 = vsel %vm921_vm5, %v918_v57, %v920_v44  ;;  %v916_v59 = vpop.permute.xlu0 %915  ;;  %v1157_v62 = vpop.permute.xlu2 %1156 }
  0xc7   : > { %v922_v60 = vsel %vm921_vm5, %v916_v59, %v918_v57  ;;  %950 = vmatpush.bf16.msra.mxu3 %v923_v58  ;;  %v1760_v59 = vld [vmem:[%s499_s9 + $0x8] sm:$0xff]  ;;  %s1906_s9 = scalar_lea.hbm %s3076_s7, %s2414_s17 }
  0xc8   : > { %936 = vmatpush.bf16.msra.mxu2 %v922_v60  ;;  %1768 = vperm.xlu1 %2473, %v1760_v59   ;;  %v2409_v60 = vld [vmem:[%s2905_s23 + $0x78] sm:$0xff]  ;;  %s1775_s23 = sld [smem:[#allocation2]]  ;;  %s1909_s5 = sshll.u32 %s1906_s9, 4  ;;  %s1910_s5 = int_to_ptr.hbm [resolvable:$true] %s1909_s5 }
  0xc9   : > { %s2493_s19 = sshra.s32 %s1910_s5, 4  ;;  %s2494_s19 = int_to_ptr.hbm [resolvable:$true] %s2493_s19 }
  0xca   : > { %s2495_s20 = scalar_lea.hbm %s2494_s19, 32  ;;  %p2500_p3 = scmp.lt.s32.totalorder %s2494_s19, %s3076_s7 }
  0xcb   : > { %p2496_p0 = scmp.ne.s32.totalorder %s2494_s19, %s2495_s20  ;;  %p2501_p4 = scmp.lt.s32.totalorder %s2499_s15, %s2495_s20 }
  0xcd   : > { %v997_v61 = vpop.permute.xlu1 %996  ;;  %p2497_p1 = pnand %p2496_p0, %p2643_p6  ;;  %p2502_p5 = por %p2501_p4, %p2500_p3 }
  0xce   : > { %v1002_v63 = vsel %vm1000_vm6, %v997_v61, %v999_v49  ;;  %v995_v0 = vpop.permute.xlu0 %994  ;;  %v1236_v8 = vpop.permute.xlu2 %1235 }
  0xcf   : > { %v1001_v3 = vsel %vm1000_vm6, %v995_v0, %v997_v61  ;;  %1029 = vmatpush.bf16.msrb.mxu1 %v1002_v63  ;;  %p2498_p2 = pneg %p2497_p1 }
  0xd0   : > { %1015 = vmatpush.bf16.msrb.mxu0 %v1001_v3 }
  0xd1   : > { %p2503_p7 = pnand %p2502_p5, %p2498_p2 }
  0xd2   : > { %2162 = vmatmul.msk.bf16.vlgmr.msrb.gmra.mxu1 %vm534_vm0, %v2373_v1 }
  0xd3   : > { %2141 = vmatmul.msk.bf16.vlgmr.msra.gmra.mxu2 %vm534_vm0, %v2369_v2  ;;  %2142 = vmatmul.msk.bf16.vlgmr.msra.gmra.mxu3 %vm534_vm0, %v2369_v2 }
  0xd4   : > { %2161 = vmatmul.msk.bf16.vlgmr.msrb.gmra.mxu0 %vm534_vm0, %v2373_v1 }
  0xd5   : > { %v1076_v4 = vpop.permute.xlu1 %1075 }
  0xd6   : > { %v1081_v5 = vsel %vm1079_vm7, %v1076_v4, %v1078_v56  ;;  %v1074_v6 = vpop.permute.xlu0 %1073  ;;  %v1315_v15 = vpop.permute.xlu2 %1314 }
  0xd7   : > { %v1080_v7 = vsel %vm1079_vm7, %v1074_v6, %v1076_v4  ;;  %1108 = vmatpush.bf16.msrb.mxu3 %v1081_v5 }
  0xd8   : > { %1094 = vmatpush.bf16.msrb.mxu2 %v1080_v7 }
  0xdc   : > { %v561_v56 = vpop.f32.mrf.mxu1  ;;  %v547_v58 = vpop.f32.mrf.mxu0 }
  0xdd   : > { %v1155_v9 = vpop.permute.xlu1 %1154 }
  0xde   : > { %v1160_v10 = vsel %vm1158_vm8, %v1155_v9, %v1157_v62  ;;  %v1153_v11 = vpop.permute.xlu0 %1152  ;;  %v1394_v20 = vpop.permute.xlu2 %1393 }
  0xdf   : > { %v1159_v14 = vsel %vm1158_vm8, %v1153_v11, %v1155_v9  ;;  %1187 = vmatpush.bf16.msra.mxu1 %v1160_v10 }
  0xe0   : > { %1173 = vmatpush.bf16.msra.mxu0 %v1159_v14 }
  0xe2   : > { %2202 = vmatmul.msk.bf16.vlgmr.msra.gmra.mxu1 %vm534_vm0, %v2381_v12 }
  0xe3   : > { %2181 = vmatmul.msk.bf16.vlgmr.msrb.gmra.mxu2 %vm534_vm0, %v2377_v13  ;;  %2182 = vmatmul.msk.bf16.vlgmr.msrb.gmra.mxu3 %vm534_vm0, %v2377_v13 }
  0xe4   : > { %2201 = vmatmul.msk.bf16.vlgmr.msra.gmra.mxu0 %vm534_vm0, %v2381_v12  ;;  %v563_v61 = vpop.f32.mrf.mxu1  ;;  %v549_v62 = vpop.f32.mrf.mxu0 }
  0xe5   : > { %v1234_v16 = vpop.permute.xlu1 %1233 }
  0xe6   : > { %v1239_v17 = vsel %vm1237_vm9, %v1234_v16, %v1236_v8  ;;  %v1232_v18 = vpop.permute.xlu0 %1231  ;;  %v1473_v28 = vpop.permute.xlu2 %1472 }
  0xe7   : > { %v1238_v19 = vsel %vm1237_vm9, %v1232_v18, %v1234_v16  ;;  %1266 = vmatpush.bf16.msra.mxu3 %v1239_v17 }
  0xe8   : > { %1252 = vmatpush.bf16.msra.mxu2 %v1238_v19 }
  0xed   : > { %v1313_v21 = vpop.permute.xlu1 %1312 }
  0xee   : > { %v1318_v22 = vsel %vm1316_vm10, %v1313_v21, %v1315_v15  ;;  %v1311_v23 = vpop.permute.xlu0 %1310  ;;  %v1552_v38 = vpop.permute.xlu2 %1551 }
  0xef   : > { %v1317_v26 = vsel %vm1316_vm10, %v1311_v23, %v1313_v21  ;;  %1345 = vmatpush.bf16.msrb.mxu1 %v1318_v22 }
  0xf0   : > { %1331 = vmatpush.bf16.msrb.mxu0 %v1317_v26 }
  0xf2   : > { %2242 = vmatmul.msk.bf16.vlgmr.msrb.gmra.mxu1 %vm534_vm0, %v2389_v24 }
  0xf3   : > { %2221 = vmatmul.msk.bf16.vlgmr.msra.gmra.mxu2 %vm534_vm0, %v2385_v25  ;;  %2222 = vmatmul.msk.bf16.vlgmr.msra.gmra.mxu3 %vm534_vm0, %v2385_v25 }
  0xf4   : > { %2241 = vmatmul.msk.bf16.vlgmr.msrb.gmra.mxu0 %vm534_vm0, %v2389_v24 }
  0xf5   : > { %v1392_v27 = vpop.permute.xlu1 %1391 }
  0xf6   : > { %v1397_v29 = vsel %vm1395_vm11, %v1392_v27, %v1394_v20  ;;  %v1390_v30 = vpop.permute.xlu0 %1389  ;;  %v1631_v43 = vpop.permute.xlu2 %1630 }
  0xf7   : > { %v1396_v31 = vsel %vm1395_vm11, %v1390_v30, %v1392_v27  ;;  %1424 = vmatpush.bf16.msrb.mxu3 %v1397_v29 }
  0xf8   : > { %1410 = vmatpush.bf16.msrb.mxu2 %v1396_v31 }
  0xfd   : > { %v1471_v32 = vpop.permute.xlu1 %1470 }
  0xfe   : > { %v1476_v33 = vsel %vm1474_vm12, %v1471_v32, %v1473_v28  ;;  %v1469_v34 = vpop.permute.xlu0 %1468  ;;  %v1710_v50 = vpop.permute.xlu2 %1709 }
  0xff   : > { %v1475_v37 = vsel %vm1474_vm12, %v1469_v34, %v1471_v32  ;;  %1503 = vmatpush.bf16.msra.mxu1 %v1476_v33 }
 0x100   : > { %1489 = vmatpush.bf16.msra.mxu0 %v1475_v37 }
 0x102   : > { %2282 = vmatmul.msk.bf16.vlgmr.msra.gmra.mxu1 %vm534_vm0, %v2397_v35 }
 0x103   : > { %2261 = vmatmul.msk.bf16.vlgmr.msrb.gmra.mxu2 %vm534_vm0, %v2393_v36  ;;  %2262 = vmatmul.msk.bf16.vlgmr.msrb.gmra.mxu3 %vm534_vm0, %v2393_v36 }
 0x104   : > { %2281 = vmatmul.msk.bf16.vlgmr.msra.gmra.mxu0 %vm534_vm0, %v2397_v35 }
 0x105   : > { %v1550_v39 = vpop.permute.xlu1 %1549 }
 0x106   : > { %v1555_v40 = vsel %vm1553_vm13, %v1550_v39, %v1552_v38  ;;  %v1548_v41 = vpop.permute.xlu0 %1547 }
 0x107   : > { %v1554_v42 = vsel %vm1553_vm13, %v1548_v41, %v1550_v39  ;;  %1582 = vmatpush.bf16.msra.mxu3 %v1555_v40 }
 0x108   : > { %1568 = vmatpush.bf16.msra.mxu2 %v1554_v42 }
 0x10d   : > { %v1629_v44 = vpop.permute.xlu1 %1628 }
 0x10e   : > { %v1634_v45 = vsel %vm1632_vm14, %v1629_v44, %v1631_v43  ;;  %v1627_v46 = vpop.permute.xlu0 %1626 }
 0x10f   : > { %v1633_v49 = vsel %vm1632_vm14, %v1627_v46, %v1629_v44  ;;  %1661 = vmatpush.bf16.msrb.mxu1 %v1634_v45 }
 0x110   : > { %1647 = vmatpush.bf16.msrb.mxu0 %v1633_v49 }
 0x112   : > { %2322 = vmatmul.msk.bf16.vlgmr.msrb.gmra.mxu1 %vm534_vm0, %v2405_v47 }
 0x113   : > { %2301 = vmatmul.msk.bf16.vlgmr.msra.gmra.mxu2 %vm534_vm0, %v2401_v48  ;;  %2302 = vmatmul.msk.bf16.vlgmr.msra.gmra.mxu3 %vm534_vm0, %v2401_v48 }
 0x114   : > { %2321 = vmatmul.msk.bf16.vlgmr.msrb.gmra.mxu0 %vm534_vm0, %v2405_v47 }
 0x115   : > { %v1708_v51 = vpop.permute.xlu1 %1707 }
 0x116   : > { %v1713_v54 = vsel %vm1711_vm15, %v1708_v51, %v1710_v50  ;;  %v1706_v55 = vpop.permute.xlu0 %1705 }
 0x117   : > { %v1712_v57 = vsel %vm1711_vm15, %v1706_v55, %v1708_v51  ;;  %1740 = vmatpush.bf16.msrb.mxu3 %v1713_v54 }
 0x118   : > { %1726 = vmatpush.bf16.msrb.mxu2 %v1712_v57  ;;  %v715_v63 = vpop.f32.mrf.mxu1 }
 0x120   : > { %v717_v1 = vpop.f32.mrf.mxu1 }
 0x123   : > { %2341 = vmatmul.msk.bf16.vlgmr.msrb.gmra.mxu2 %vm534_vm0, %v2409_v60  ;;  %2342 = vmatmul.msk.bf16.vlgmr.msrb.gmra.mxu3 %vm534_vm0, %v2409_v60 }
 0x12f   : > { %v701_v0 = vpop.f32.mrf.mxu0 }
 0x136   : > { %v622_v2 = vpop.f32.mrf.mxu2  ;;  %v636_v3 = vpop.f32.mrf.mxu3 }
 0x137   : > { %v641_v4 = vadd.f32 %v622_v2, %v547_v58  ;;  %v642_v5 = vadd.f32 %v636_v3, %v561_v56  ;;  %v703_v6 = vpop.f32.mrf.mxu0 }
 0x139   : > { %v720_v7 = vadd.f32 %v701_v0, %v641_v4  ;;  %v721_v8 = vadd.f32 %v715_v63, %v642_v5 }
 0x13e   : > { %v624_v9 = vpop.f32.mrf.mxu2  ;;  %v638_v10 = vpop.f32.mrf.mxu3 }
 0x13f   : > { %v643_v11 = vadd.f32 %v624_v9, %v549_v62  ;;  %v644_v12 = vadd.f32 %v638_v10, %v563_v61  ;;  %v873_v13 = vpop.f32.mrf.mxu1 }
 0x141   : > { %v722_v14 = vadd.f32 %v703_v6, %v643_v11  ;;  %v723_v15 = vadd.f32 %v717_v1, %v644_v12  ;;  %v859_v16 = vpop.f32.mrf.mxu0 }
 0x146   : > { %v780_v17 = vpop.f32.mrf.mxu2  ;;  %v794_v18 = vpop.f32.mrf.mxu3 }
 0x147   : > { %v799_v19 = vadd.f32 %v780_v17, %v720_v7  ;;  %v800_v20 = vadd.f32 %v794_v18, %v721_v8  ;;  %v875_v21 = vpop.f32.mrf.mxu1 }
 0x149   : > { %v861_v22 = vpop.f32.mrf.mxu0  ;;  %v878_v53 = vadd.f32 %v859_v16, %v799_v19  ;;  %v879_v54 = vadd.f32 %v873_v13, %v800_v20 }
 0x14e   : > { %v782_v23 = vpop.f32.mrf.mxu2  ;;  %v796_v24 = vpop.f32.mrf.mxu3 }
 0x14f   : > { %v801_v25 = vadd.f32 %v782_v23, %v722_v14  ;;  %v802_v26 = vadd.f32 %v796_v24, %v723_v15  ;;  %v1031_v27 = vpop.f32.mrf.mxu1 }
 0x151   : > { %v1017_v28 = vpop.f32.mrf.mxu0  ;;  %v880_v61 = vadd.f32 %v861_v22, %v801_v25  ;;  %v881_v62 = vadd.f32 %v875_v21, %v802_v26 }
 0x156   : > { %v938_v29 = vpop.f32.mrf.mxu2  ;;  %v952_v30 = vpop.f32.mrf.mxu3 }
 0x157   : > { %v1033_v32 = vpop.f32.mrf.mxu1  ;;  %v957_v55 = vadd.f32 %v938_v29, %v878_v53  ;;  %v958_v56 = vadd.f32 %v952_v30, %v879_v54  ;;  %v1784_v53 = vstv %s1775_s23  ;;  %s493_s23 = scalar_lea.vmem [#allocation4], %s2022_s30 }
 0x158   : > { %s1907_s21 = sshll.u32 %s493_s23, 4  ;;  %s1908_s21 = int_to_ptr.vmem [resolvable:$true] %s1907_s21 }
 0x159   : > { %v1019_v31 = vpop.f32.mrf.mxu0  ;;  %v1036_v59 = vadd.f32 %v1017_v28, %v957_v55  ;;  %v1037_v60 = vadd.f32 %v1031_v27, %v958_v56 }
 0x15e   : > { %v940_v33 = vpop.f32.mrf.mxu2  ;;  %v954_v34 = vpop.f32.mrf.mxu3 }
 0x15f   : > { %v1189_v36 = vpop.f32.mrf.mxu1  ;;  %v959_v3 = vadd.f32 %v940_v33, %v880_v61  ;;  %v960_v4 = vadd.f32 %v954_v34, %v881_v62 }
 0x161   : > { %v1175_v35 = vpop.f32.mrf.mxu0  ;;  %v1038_v7 = vadd.f32 %v1019_v31, %v959_v3  ;;  %v1039_v8 = vadd.f32 %v1033_v32, %v960_v4 }
 0x166   : > { %v1096_v37 = vpop.f32.mrf.mxu2  ;;  %v1110_v38 = vpop.f32.mrf.mxu3 }
 0x167   : > { %v1191_v40 = vpop.f32.mrf.mxu1  ;;  %v1115_v1 = vadd.f32 %v1096_v37, %v1036_v59  ;;  %v1116_v2 = vadd.f32 %v1110_v38, %v1037_v60 }
 0x169   : > { %v1177_v39 = vpop.f32.mrf.mxu0  ;;  %v1194_v5 = vadd.f32 %v1175_v35, %v1115_v1  ;;  %v1195_v6 = vadd.f32 %v1189_v36, %v1116_v2 }
 0x16e   : > { %v1098_v41 = vpop.f32.mrf.mxu2  ;;  %v1112_v42 = vpop.f32.mrf.mxu3 }
 0x16f   : > { %v1347_v46 = vpop.f32.mrf.mxu1  ;;  %v1117_v13 = vadd.f32 %v1098_v41, %v1038_v7  ;;  %v1118_v14 = vadd.f32 %v1112_v42, %v1039_v8 }
 0x171   : > { %v1333_v45 = vpop.f32.mrf.mxu0  ;;  %v1196_v19 = vadd.f32 %v1177_v39, %v1117_v13  ;;  %v1197_v20 = vadd.f32 %v1191_v40, %v1118_v14  ;;  %v1764_v39 = vpop.permute.xlu0 %1763 }
 0x176   : > { %v1254_v43 = vpop.f32.mrf.mxu2  ;;  %v1268_v44 = vpop.f32.mrf.mxu3 }
 0x177   : > { %v1349_v50 = vpop.f32.mrf.mxu1  ;;  %v1273_v9 = vadd.f32 %v1254_v43, %v1194_v5  ;;  %v1274_v10 = vadd.f32 %v1268_v44, %v1195_v6 }
 0x179   : > { %v1335_v49 = vpop.f32.mrf.mxu0  ;;  %v1352_v17 = vadd.f32 %v1333_v45, %v1273_v9  ;;  %v1353_v18 = vadd.f32 %v1347_v46, %v1274_v10 }
 0x17e   : > { %v1256_v47 = vpop.f32.mrf.mxu2  ;;  %v1270_v48 = vpop.f32.mrf.mxu3 }
 0x17f   : > { %v1505_v58 = vpop.f32.mrf.mxu1  ;;  %v1275_v23 = vadd.f32 %v1256_v47, %v1196_v19  ;;  %v1276_v24 = vadd.f32 %v1270_v48, %v1197_v20 }
 0x181   : > { %v1491_v57 = vpop.f32.mrf.mxu0  ;;  %v1354_v31 = vadd.f32 %v1335_v49, %v1275_v23  ;;  %v1355_v32 = vadd.f32 %v1349_v50, %v1276_v24  ;;  %v1857_v23 = vld [vmem:[%s505_s25] sm:$0xff]  ;;  %v1858_v24 = vld [vmem:[%s505_s25 + $0x8] sm:$0xff] }
 0x186   : > { %v1412_v51 = vpop.f32.mrf.mxu2  ;;  %v1426_v52 = vpop.f32.mrf.mxu3 }
 0x187   : > { %v1507_v12 = vpop.f32.mrf.mxu1  ;;  %v1431_v21 = vadd.f32 %v1412_v51, %v1352_v17  ;;  %v1432_v22 = vadd.f32 %v1426_v52, %v1353_v18  ;;  %v1793_v52 = vld [vmem:[%s3075_s6] sm:$0x3] }
 0x188   : > { %v1796_v59 = vperm.slane %v1793_v52, 1 }
 0x189   : > { %v1493_v11 = vpop.f32.mrf.mxu0  ;;  %v1510_v27 = vadd.f32 %v1491_v57, %v1431_v21  ;;  %v1511_v28 = vadd.f32 %v1505_v58, %v1432_v22  ;;  %v1795_v58 = vperm.slane %v1793_v52, 0 }
 0x18e   : > { %v1414_v63 = vpop.f32.mrf.mxu2  ;;  %v1428_v0 = vpop.f32.mrf.mxu3 }
 0x18f   : > { %v1663_v30 = vpop.f32.mrf.mxu1  ;;  %v1433_v35 = vadd.f32 %v1414_v63, %v1354_v31  ;;  %v1434_v36 = vadd.f32 %v1428_v0, %v1355_v32  ;;  %v1769_v0 = vpop.permute.xlu1 %1768 }
 0x191   : > { %v1649_v29 = vpop.f32.mrf.mxu0  ;;  %v1512_v40 = vadd.f32 %v1493_v11, %v1433_v35  ;;  %v1513_v41 = vadd.f32 %v1507_v12, %v1434_v36 }
 0x196   : > { %v1570_v15 = vpop.f32.mrf.mxu2  ;;  %v1584_v16 = vpop.f32.mrf.mxu3 }
 0x197   : > { %v1589_v33 = vadd.f32 %v1570_v15, %v1510_v27  ;;  %v1590_v34 = vadd.f32 %v1584_v16, %v1511_v28  ;;  %v1665_v51 = vpop.f32.mrf.mxu1 }
 0x199   : > { %v1668_v37 = vadd.f32 %v1649_v29, %v1589_v33  ;;  %v1669_v38 = vadd.f32 %v1663_v30, %v1590_v34  ;;  %v1651_v48 = vpop.f32.mrf.mxu0 }
 0x19e   : > { %v1572_v25 = vpop.f32.mrf.mxu2  ;;  %v1586_v26 = vpop.f32.mrf.mxu3 }
 0x19f   : > { %v1591_v46 = vadd.f32 %v1572_v25, %v1512_v40  ;;  %v1592_v47 = vadd.f32 %v1586_v26, %v1513_v41 }
 0x1a1   : > { %v1670_v56 = vadd.f32 %v1651_v48, %v1591_v46  ;;  %v1671_v57 = vadd.f32 %v1665_v51, %v1592_v47 }
 0x1a6   : > { %v1728_v42 = vpop.f32.mrf.mxu2  ;;  %v1742_v43 = vpop.f32.mrf.mxu3 }
 0x1a7   : > { %v1747_v44 = vadd.f32 %v1728_v42, %v1668_v37  ;;  %v1748_v45 = vadd.f32 %v1742_v43, %v1669_v38  ;;  %v1873_v43 = vld [vmem:[%s511_s24] sm:$0xff] }
 0x1a9   : > { %v1771_v49 = vadd.f32 %v1764_v39, %v1747_v44  ;;  %v1772_v50 = vadd.f32 %v1764_v39, %v1748_v45  ;;  %v1874_v44 = vld [vmem:[%s511_s24 + $0x8] sm:$0xff] }
 0x1ab   : > { %v1780_v54 = vmin.f32 %v1771_v49, 0.0  ;;  %v1781_v55 = vmin.f32 %v1772_v50, 0.0  ;;  %v1776_v60 = vmax.f32 %v1771_v49, 0.0  ;;  %v1777_v61 = vmax.f32 %v1772_v50, 0.0 }
 0x1ad   : > { %v1785_v62 = vmul.f32 %v1784_v53, %v1780_v54  ;;  %v1786_v63 = vmul.f32 %v1784_v53, %v1781_v55 }
 0x1ae   : > { %v1730_v1 = vpop.f32.mrf.mxu2  ;;  %v1744_v2 = vpop.f32.mrf.mxu3 }
 0x1af   : > { %v1749_v3 = vadd.f32 %v1730_v1, %v1670_v56  ;;  %v1750_v4 = vadd.f32 %v1744_v2, %v1671_v57  ;;  %v1789_v5 = vadd.f32 %v1785_v62, %v1776_v60  ;;  %v1790_v6 = vadd.f32 %v1786_v63, %v1777_v61 }
 0x1b1   : > { %v1773_v7 = vadd.f32 %v1769_v0, %v1749_v3  ;;  %v1774_v8 = vadd.f32 %v1769_v0, %v1750_v4  ;;  %v1799_v9 = vmul.f32 %v1795_v58, %v1789_v5  ;;  %v1800_v10 = vmul.f32 %v1796_v59, %v1790_v6 }
 0x1b3   : > { %v1782_v11 = vmin.f32 %v1773_v7, 0.0  ;;  %v1783_v12 = vmin.f32 %v1774_v8, 0.0  ;;  %v1803_v13 = vadd.f32 %v1800_v10, %v1799_v9  ;;  %v1778_v14 = vmax.f32 %v1773_v7, 0.0 }
 0x1b4   : > { %v1779_v15 = vmax.f32 %v1774_v8, 0.0 }
 0x1b5   : > { %v1787_v16 = vmul.f32 %v1784_v53, %v1782_v11  ;;  %v1788_v17 = vmul.f32 %v1784_v53, %v1783_v12  ;;  %1804 = vadd.xlane.f32.xlu2 %v1803_v13 }
 0x1b7   : > { %v1791_v18 = vadd.f32 %v1787_v16, %v1778_v14  ;;  %v1792_v19 = vadd.f32 %v1788_v17, %v1779_v15 }
 0x1b9   : > { %v1801_v20 = vmul.f32 %v1795_v58, %v1791_v18  ;;  %v1802_v21 = vmul.f32 %v1796_v59, %v1792_v19 }
 0x1bb   : > { %v1806_v22 = vadd.f32 %v1802_v21, %v1801_v20 }
 0x1bd   : > { %1807 = vadd.xlane.f32.xlu1 %v1806_v22 }
 0x1cd   : > { %1861 = vperm.xlu2 %2474, %v1857_v23  }
 0x1d6   : > { %1866 = vperm.xlu1 %2473, %v1858_v24  }
 0x228   : > { %v1805_v25 = vpop.xlane.xlu2 %1804 }
 0x229   : > { %v1809_v26 = vmul.f32 0.010204081, %v1805_v25 }
 0x22b   : > { %v1811_v27 = vsub.f32 %v1789_v5, %v1809_v26  ;;  %v1812_v28 = vsub.f32 %v1790_v6, %v1809_v26 }
 0x22d   : > { %v1815_v29 = vmul.f32 %v1811_v27, %v1795_v58  ;;  %v1816_v30 = vmul.f32 %v1812_v28, %v1796_v59 }
 0x22f   : > { %v1819_v32 = vmul.f32 %v1815_v29, %v1815_v29  ;;  %v1820_v33 = vmul.f32 %v1816_v30, %v1816_v30 }
 0x230   : > { %v1808_v31 = vpop.xlane.xlu1 %1807  ;;  %v1862_v45 = vpop.permute.xlu2 %1861 }
 0x231   : > { %v1810_v34 = vmul.f32 0.010204081, %v1808_v31  ;;  %v1823_v35 = vadd.f32 %v1820_v33, %v1819_v32 }
 0x233   : > { %v1813_v36 = vsub.f32 %v1791_v18, %v1810_v34  ;;  %v1814_v37 = vsub.f32 %v1792_v19, %v1810_v34  ;;  %1824 = vadd.xlane.f32.xlu0 %v1823_v35 }
 0x235   : > { %v1817_v38 = vmul.f32 %v1813_v36, %v1795_v58  ;;  %v1818_v39 = vmul.f32 %v1814_v37, %v1796_v59 }
 0x237   : > { %v1821_v40 = vmul.f32 %v1817_v38, %v1817_v38  ;;  %v1822_v41 = vmul.f32 %v1818_v39, %v1818_v39 }
 0x239   : > { %v1826_v42 = vadd.f32 %v1822_v41, %v1821_v40 }
 0x23b   : > { %1827 = vadd.xlane.f32.xlu2 %v1826_v42 }
 0x247   : > { %1877 = vperm.xlu0 %2472, %v1873_v43  }
 0x248   : > { %v1867_v11 = vpop.permute.xlu1 %1866 }
 0x253   : > { %1882 = vperm.xlu2 %2474, %v1874_v44  }
 0x2a6   : > { %v1825_v46 = vpop.xlane.xlu0 %1824 }
 0x2a7   : > { %v1829_v47 = vmul.f32 0.010204081, %v1825_v46 }
 0x2a9   : > { %v1831_v48 = vadd.f32 1e-05, %v1829_v47 }
 0x2ab   : > { %2475 = vrsqrt.f32 %v1831_v48  ;;  %vm1839_vm1 = vweird.f32 %v1831_v48 }
 0x2ae   : > { %v1828_v51 = vpop.xlane.xlu2 %1827 }
 0x2af   : > { %v1830_v49 = vmul.f32 0.010204081, %v1828_v51 }
 0x2b1   : > { %v1832_v50 = vadd.f32 1e-05, %v1830_v49  ;;  %v2476_v52 = vpop.eup %2475 }
 0x2b2   : > { %v1834_v53 = vmul.f32 %v2476_v52, %v1831_v48  ;;  %vm1840_vm0 = vweird.f32 %v2476_v52 }
 0x2b3   : > { %2477 = vrsqrt.f32 %v1832_v50  ;;  %vm1841_vm2 = vmor %vm1839_vm1, %vm1840_vm0  ;;  %vm1849_vm4 = vweird.f32 %v1832_v50 }
 0x2b4   : > { %v1835_v54 = vmul.f32 %v2476_v52, %v1834_v53 }
 0x2b6   : > { %v1836_v55 = vmul.f32 0.5, %v1835_v54  ;;  %v1883_v14 = vpop.permute.xlu2 %1882 }
 0x2b8   : > { %v1837_v57 = vsub.f32 1.5, %v1836_v55 }
 0x2b9   : > { %v2478_v56 = vpop.eup %2477  ;;  %v1878_v4 = vpop.permute.xlu0 %1877 }
 0x2ba   : > { %v1844_v58 = vmul.f32 %v2478_v56, %v1832_v50  ;;  %v1838_v59 = vmul.f32 %v2476_v52, %v1837_v57  ;;  %vm1850_vm3 = vweird.f32 %v2478_v56 }
 0x2bb   : > { %vm1851_vm5 = vmor %vm1849_vm4, %vm1850_vm3 }
 0x2bc   : > { %v1845_v60 = vmul.f32 %v2478_v56, %v1844_v58  ;;  %v1842_v61 = vsel %vm1841_vm2, %v2476_v52, %v1838_v59 }
 0x2bd   : > { %v1853_v63 = vmul.f32 %v1842_v61, %v1815_v29  ;;  %v1854_v0 = vmul.f32 %v1842_v61, %v1816_v30 }
 0x2be   : > { %v1846_v62 = vmul.f32 0.5, %v1845_v60 }
 0x2bf   : > { %v1869_v2 = vmul.f32 %v1862_v45, %v1853_v63  ;;  %v1870_v3 = vmul.f32 %v1862_v45, %v1854_v0 }
 0x2c0   : > { %v1847_v1 = vsub.f32 1.5, %v1846_v62 }
 0x2c1   : > { %v1885_v6 = vadd.f32 %v1878_v4, %v1869_v2  ;;  %v1886_v7 = vadd.f32 %v1878_v4, %v1870_v3 }
 0x2c2   : > { %v1848_v5 = vmul.f32 %v2478_v56, %v1847_v1 }
 0x2c3   : > { %1889 = vst [vmem:[%s493_s23] sm:$0xff] %v1885_v6 }
 0x2c4   : > { %v1852_v8 = vsel %vm1851_vm5, %v2478_v56, %v1848_v5  ;;  %1890 = vst [vmem:[%s493_s23 + $0x8] sm:$0xff] %v1886_v7 }
 0x2c5   : > { %v1855_v9 = vmul.f32 %v1852_v8, %v1817_v38  ;;  %v1856_v10 = vmul.f32 %v1852_v8, %v1818_v39 }
 0x2c7   : > { %v1871_v12 = vmul.f32 %v1867_v11, %v1855_v9  ;;  %v1872_v13 = vmul.f32 %v1867_v11, %v1856_v10 }
 0x2c9   : > { %v1887_v15 = vadd.f32 %v1883_v14, %v1871_v12  ;;  %v1888_v16 = vadd.f32 %v1883_v14, %v1872_v13 }
 0x2cb   : > { %1891 = vst [vmem:[%s493_s23 + $0x10] sm:$0xff] %v1887_v15 }
 0x2cc   : > { %1892 = vst [vmem:[%s493_s23 + $0x18] sm:$0xff] %v1888_v16 }
 0x2cd   : > { %2506 = shalt.err (!%p2503_p7)
}
 0x2ce   : > { %s2559_s14 = smov 256   ;;  %s2560_s17 = smov 16  }
 0x2cf   : > { %2415 = dma.vmem_to_hbm [thread:$0]  (%p2643_p6), %s1908_s21, 512, %s1910_s5, %s1894_s18, %s2559_s14, %s2559_s14, %s2560_s17  }
 0x2d0 PF: > { %s1924_s16 = sand.u32 1, %s2529_s26   ;;  %p2418_p10 = pnand %p2016_p9, %p2647_p8 }
 0x2d1   : > { %s1925_s10 = scalar_lea.sflag [#allocation5], %s1924_s16 }
 0x2d2   : > { %p2419_p11 = pneg %p2418_p10 }
 0x2d4   : > { %2524 = dma.done.wait (%p2419_p11), %s1925_s10, 512  }
 0x2d5   : > { %2526 = vsyncadd (%p2419_p11), %s1925_s10, 4294966784  ;;  %p18_p12 = scmp.ge.s32.totalorder %s2629_s8, 4   ;;  %s3079_s26 = smov %s2533_s27 }
 0x2d6   : > { %s3080_s27 = smov %s2537_s28  ;;  %s3081_s28 = smov %s2641_s11 }
 0x2d7   : > { %s3082_s29 = smov %s2629_s8  ;;  %20 = sbr.rel (!%p18_p12) target bundleno = 5 (0x5), region = 153 }
 0x2dc   :  { %1931 = vsyncpa [#allocation5], 1 }
 0x2dd   :  { %1933 = vsyncpa [#allocation5 + $0x1], 1 }

</bundles_post_ra>
